<compile_context>
chip_gen: v6e
topology: v6e:2x2x1
jax: 0.10.0
libtpu: 0.0.40
codegen_flags: <defaults>
</compile_context>

<pallas_src>
import math

import jax
import jax.numpy as jnp
from jax.experimental import pallas as pl

B = 2        # batch
T = 8        # target sequence length
S = 8        # source (memory) sequence length
D = 32       # d_model
H = 4        # attention heads
DK = D // H  # per-head dim
F = 64       # d_ff
EPS = 1e-6
NEG = -1e9


# ---------------- faithful f32 reference (mirrors the PyTorch module) ----------------
def _layernorm(x, a, b):
    # Annotated-Transformer LayerNorm: torch.std default is unbiased (ddof=1).
    mean = jnp.mean(x, axis=-1, keepdims=True)
    var = jnp.sum((x - mean) ** 2, axis=-1, keepdims=True) / (x.shape[-1] - 1)
    return a * (x - mean) / (jnp.sqrt(var) + EPS) + b


def _mha_ref(q_in, kv_in, mask, w, bias):
    q = q_in @ w[0] + bias[0:1, :]
    k = kv_in @ w[1] + bias[1:2, :]
    v = kv_in @ w[2] + bias[2:3, :]
    out = jnp.zeros((q_in.shape[0], D), jnp.float32)
    for h in range(H):
        lo, hi = h * DK, (h + 1) * DK
        qh, kh, vh = q[:, lo:hi], k[:, lo:hi], v[:, lo:hi]
        s = qh @ kh.T / math.sqrt(DK)
        s = jnp.where(mask == 0.0, NEG, s)
        s = s - jnp.max(s, axis=-1, keepdims=True)
        p = jnp.exp(s)
        p = p / jnp.sum(p, axis=-1, keepdims=True)
        out = out + (p @ vh) @ w[3][lo:hi, :]
    return out + bias[3:4, :]


def _decoder_layer_ref(x, m, tmask, smask, aw, ab, w1, b1, w2, b2, lna, lnb):
    h0 = _layernorm(x, lna[0:1, :], lnb[0:1, :])
    x = x + _mha_ref(h0, h0, tmask, aw[0], ab[0])
    h1 = _layernorm(x, lna[1:2, :], lnb[1:2, :])
    x = x + _mha_ref(h1, m, smask, aw[1], ab[1])
    h2 = _layernorm(x, lna[2:3, :], lnb[2:3, :])
    hid = jnp.maximum(h2 @ w1 + b1, 0.0)
    return x + hid @ w2 + b2


# ---------------- Pallas kernel -------------------------------------------------------
def _make_decoder_kernel(Bb, Tt, Ss, Dd, Hh, Ff):
    Dk = Dd // Hh
    BT = Bb * Tt
    BS = Bb * Ss
    bf16 = jnp.bfloat16
    f32 = jnp.float32

    # weight-slab lane offsets (must match packing in decoder_layer())
    O_QKV, O_QS, O_KVS = 0, 3 * Dd, 4 * Dd
    O_WO0, O_WO1 = 6 * Dd, 7 * Dd
    O_W1, O_W2T = 8 * Dd, 8 * Dd + Ff
    # bias-slab rows
    R_QKV, R_QS, R_KVS, R_BO0, R_BO1, R_B1, R_B2 = range(7)

    def ln(z):
        # LayerNorm with the affine (a, b) folded into the downstream weights.
        mean = jnp.mean(z, axis=-1, keepdims=True)
        var = jnp.sum((z - mean) ** 2, axis=-1, keepdims=True) * (1.0 / (Dd - 1))
        return (z - mean) / (jnp.sqrt(var) + EPS)

    def attention(q2, k2, v2, mbias, wo, bo, Lk):
        # q2: (BT, D) f32 (1/sqrt(dk) already folded into the Q projection)
        # k2/v2: (B*Lk, D) f32; mbias: (B, T, Lk) additive bias; wo: (D, D) bf16.
        q3 = q2.astype(bf16).reshape(Bb, Tt, Dd)      # cast once -> bf16 MXU operands
        k3 = k2.astype(bf16).reshape(Bb, Lk, Dd)
        v3 = v2.astype(bf16).reshape(Bb, Lk, Dd)
        acc = jnp.zeros((BT, Dd), f32)
        for h in range(Hh):                           # static unrolled head loop (H = 4)
            lo = h * Dk
            qh = q3[:, :, lo:lo + Dk]
            kh = k3[:, :, lo:lo + Dk]
            vh = v3[:, :, lo:lo + Dk]
            s = jnp.einsum("bqd,bkd->bqk", qh, kh,
                           preferred_element_type=f32) + mbias
            s = s - jnp.max(s, axis=-1, keepdims=True)
            p = jnp.exp(s)
            p = p * pl.reciprocal(jnp.sum(p, axis=-1, keepdims=True), approx=True)
            ctx = jnp.einsum("bqk,bkd->bqd", p.astype(bf16), vh,
                             preferred_element_type=f32)             # (B, T, DK)
            # reference-style per-head accumulation through Wo row slices
            # (replaces the lane-wise head concat / relayout)
            acc = acc + jnp.dot(ctx.reshape(BT, Dk).astype(bf16),
                                wo[lo:lo + Dk, :], preferred_element_type=f32)
        return acc + bo

    def kernel(xm_ref, mask_ref, w_ref, b_ref, out_ref):
        x = xm_ref[0:BT, :]                       # (BT, D) f32 residual stream
        m = xm_ref[BT:BT + BS, :]                 # (BS, D) f32 encoder memory

        mask = mask_ref[...]                      # (B, T, T+S)
        tbias = jnp.where(mask[:, :, 0:Tt] == 0.0, NEG, 0.0)          # (B, T, T)
        sbias = jnp.where(mask[:, :, Tt:Tt + Ss] == 0.0, NEG, 0.0)    # (B, T, S)

        wo0 = w_ref[:, O_WO0:O_WO0 + Dd]
        wo1 = w_ref[:, O_WO1:O_WO1 + Dd]

        # ---- sublayer 0: self-attention (fused Q|K|V projection, LN0 folded) ----
        xn = ln(x).astype(bf16)
        qkv = jnp.dot(xn, w_ref[:, O_QKV:O_QKV + 3 * Dd],
                      preferred_element_type=f32) + b_ref[R_QKV:R_QKV + 1, 0:3 * Dd]
        x = x + attention(qkv[:, 0:Dd], qkv[:, Dd:2 * Dd], qkv[:, 2 * Dd:3 * Dd],
                          tbias, wo0, b_ref[R_BO0:R_BO0 + 1, 0:Dd], Tt)

        # ---- sublayer 1: source attention (fused K|V projection of memory) ----
        xn = ln(x).astype(bf16)
        q = jnp.dot(xn, w_ref[:, O_QS:O_QS + Dd],
                    preferred_element_type=f32) + b_ref[R_QS:R_QS + 1, 0:Dd]
        kv = jnp.dot(m.astype(bf16), w_ref[:, O_KVS:O_KVS + 2 * Dd],
                     preferred_element_type=f32) + b_ref[R_KVS:R_KVS + 1, 0:2 * Dd]
        x = x + attention(q, kv[:, 0:Dd], kv[:, Dd:2 * Dd],
                          sbias, wo1, b_ref[R_BO1:R_BO1 + 1, 0:Dd], Ss)

        # ---- sublayer 2: position-wise feed-forward (LN2 folded into W1) ----
        xn = ln(x).astype(bf16)
        hid = jnp.maximum(
            jnp.dot(xn, w_ref[:, O_W1:O_W1 + Ff],
                    preferred_element_type=f32) + b_ref[R_B1:R_B1 + 1, 0:Ff], 0.0)
        # W2 is stored transposed (D, F) in the slab: contract both on their F axis.
        ff = jnp.einsum("nf,df->nd", hid.astype(bf16), w_ref[:, O_W2T:O_W2T + Ff],
                        preferred_element_type=f32) + b_ref[R_B2:R_B2 + 1, 0:Dd]
        x = x + ff

        out_ref[...] = x.astype(out_ref.dtype)

    return kernel


def decoder_layer(x, mem, tgt_mask, src_mask, params, *, n_heads=H):
    aw, ab, w1, b1, w2, b2, lna, lnb = params
    Bb, Tt, Dd = x.shape
    Ss = mem.shape[1]
    Ff = w1.shape[1]
    Dk = Dd // n_heads
    scale = 1.0 / math.sqrt(Dk)
    f32 = jnp.float32

    # --- fold LayerNorm affine (a, b) and 1/sqrt(dk) into the projections (exact) ---
    #   (a*z + b) @ W + c  ==  z @ (a[:, None] * W) + (b @ W + c)
    a0, c0 = lna[0], lnb[0]
    a1, c1 = lna[1], lnb[1]
    a2, c2 = lna[2], lnb[2]

    wq0 = a0[:, None] * aw[0, 0] * scale
    wk0 = a0[:, None] * aw[0, 1]
    wv0 = a0[:, None] * aw[0, 2]
    bq0 = (c0 @ aw[0, 0] + ab[0, 0]) * scale
    bk0 = c0 @ aw[0, 1] + ab[0, 1]
    bv0 = c0 @ aw[0, 2] + ab[0, 2]

    wqs = a1[:, None] * aw[1, 0] * scale
    bqs = (c1 @ aw[1, 0] + ab[1, 0]) * scale
    wks, wvs = aw[1, 1], aw[1, 2]            # memory is NOT layer-normed
    bks, bvs = ab[1, 1], ab[1, 2]

    w1f = a2[:, None] * w1
    b1f = c2 @ w1 + b1.reshape(-1)
    b2f = b2.reshape(-1)

    # --- bf16 weight slab: everything sharing K = D rows, one DMA ---
    wslab = jnp.concatenate(
        [wq0, wk0, wv0,            # fused Q|K|V (self)     lanes [0, 3D)
         wqs,                      # Q (src)                 [3D, 4D)
         wks, wvs,                 # fused K|V (src)         [4D, 6D)
         aw[0, 3], aw[1, 3],       # Wo (self), Wo (src)     [6D, 8D)
         w1f,                      # FFN W1 (LN2 folded)     [8D, 8D+F)
         w2.T],                    # FFN W2 transposed       [8D+F, 8D+2F)
        axis=1).astype(jnp.bfloat16)

    # --- f32 bias slab: one row per bias, lane-padded ---
    blane = max(128, 3 * Dd, 2 * Dd, Ff)

    def _row(v):
        return jnp.pad(v.astype(f32), (0, blane - v.shape[0]))

    bslab = jnp.stack([
        _row(jnp.concatenate([bq0, bk0, bv0])),   # row 0: fused QKV bias (self)
        _row(bqs),                                # row 1: Q bias (src)
        _row(jnp.concatenate([bks, bvs])),        # row 2: fused KV bias (src)
        _row(ab[0, 3]),                           # row 3: Wo bias (self)
        _row(ab[1, 3]),                           # row 4: Wo bias (src)
        _row(b1f),                                # row 5: FFN b1 (LN2 folded)
        _row(b2f),                                # row 6: FFN b2
        jnp.zeros((blane,), f32),                 # row 7: pad to 8 sublanes
    ])

    # --- activations: x rows and memory rows share one slab; masks share another ---
    xm = jnp.concatenate([x.reshape(Bb * Tt, Dd), mem.reshape(Bb * Ss, Dd)], axis=0)
    masks = jnp.concatenate([tgt_mask, src_mask], axis=-1).astype(f32)   # (B, T, T+S)

    kernel = _make_decoder_kernel(Bb, Tt, Ss, Dd, n_heads, Ff)

    # Whole problem (~35 KiB) lives in VMEM: gridless pallas_call -> a single
    # invocation with 4 input DMAs + 1 output DMA and no double buffering.
    out2 = pl.pallas_call(
        kernel,
        out_shape=jax.ShapeDtypeStruct((Bb * Tt, Dd), x.dtype),
    )(xm, masks, wslab, bslab)

    return out2.reshape(Bb, Tt, Dd)


# ---------------- driver ----------------------------------------------------------
if __name__ == "__main__":
    key = jax.random.PRNGKey(0)
    keys = jax.random.split(key, 10)

    # inputs
    x = jax.random.normal(keys[0], (B, T, D), jnp.float32)
    mem = jax.random.normal(keys[1], (B, S, D), jnp.float32)
    # masks: 1.0 = attend, 0.0 = masked (as in scores.masked_fill(mask == 0, -1e9))
    tgt_mask = jnp.broadcast_to(jnp.tril(jnp.ones((T, T), jnp.float32)), (B, T, T))
    src_mask = jnp.ones((B, T, S), jnp.float32)

    # deterministic synthetic parameters
    aw = 0.05 * jax.random.normal(keys[2], (2, 4, D, D), jnp.float32)   # [self/src][q,k,v,o]
    ab = 0.05 * jax.random.normal(keys[3], (2, 4, D), jnp.float32)
    w1 = 0.05 * jax.random.normal(keys[4], (D, F), jnp.float32)
    b1 = 0.05 * jax.random.normal(keys[5], (1, F), jnp.float32)
    w2 = 0.05 * jax.random.normal(keys[6], (F, D), jnp.float32)
    b2 = 0.05 * jax.random.normal(keys[7], (1, D), jnp.float32)
    lna = 1.0 + 0.1 * jax.random.normal(keys[8], (3, D), jnp.float32)   # LayerNorm a_2
    lnb = 0.1 * jax.random.normal(keys[9], (3, D), jnp.float32)         # LayerNorm b_2
    params = (aw, ab, w1, b1, w2, b2, lna, lnb)

    out = decoder_layer(x, mem, tgt_mask, src_mask, params)
    out = jax.block_until_ready(out)

    # pure-f32, PyTorch-faithful reference (per-head loop), vmapped over batch
    ref = jax.vmap(
        lambda xb, mb, tm, sm: _decoder_layer_ref(
            xb, mb, tm, sm, aw, ab, w1, b1, w2, b2, lna, lnb)
    )(x, mem, tgt_mask, src_mask)

    assert out.shape == (B, T, D)
    assert bool(jnp.all(jnp.isfinite(out)))
    # bf16 MXU operands + approx softmax reciprocal in the kernel vs exact-f32 ref:
    # tolerance is loose enough for the precision delta but tight enough for wiring bugs.
    assert bool(jnp.allclose(out, ref, rtol=2e-2, atol=2e-2)), "kernel/reference mismatch"
    print("KERNEL_OK")
</pallas_src>

<mosaic_0001>
module attributes {stable_mosaic.version = 11 : i64} {
  func.func @kernel(%arg0: memref<32x32xf32, #tpu.memory_space<vmem>>, %arg1: memref<2x8x16xf32, #tpu.memory_space<vmem>>, %arg2: memref<32x384xbf16, #tpu.memory_space<vmem>>, %arg3: memref<8x128xf32, #tpu.memory_space<vmem>>, %arg4: memref<16x32xf32, #tpu.memory_space<vmem>>) attributes {dimension_semantics = [], scalar_prefetch = 0 : i64, scratch_operands = 0 : i64, tpu.core_type = #tpu.core_type<tc>} {
    %c0 = arith.constant 0 : index
    %c0_0 = arith.constant 0 : index
    %0 = vector.load %arg0[%c0, %c0_0] : memref<32x32xf32, #tpu.memory_space<vmem>>, vector<16x32xf32>
    %c16 = arith.constant 16 : index
    %c0_1 = arith.constant 0 : index
    %1 = vector.load %arg0[%c16, %c0_1] : memref<32x32xf32, #tpu.memory_space<vmem>>, vector<16x32xf32>
    %c0_2 = arith.constant 0 : index
    %c0_3 = arith.constant 0 : index
    %c0_4 = arith.constant 0 : index
    %2 = vector.load %arg1[%c0_2, %c0_3, %c0_4] : memref<2x8x16xf32, #tpu.memory_space<vmem>>, vector<2x8x16xf32>
    %3 = vector.extract_strided_slice %2 {offsets = [0, 0, 0], sizes = [2, 8, 8], strides = [1, 1, 1]} : vector<2x8x16xf32> to vector<2x8x8xf32>
    %cst = arith.constant 0.000000e+00 : f32
    %4 = vector.broadcast %cst : f32 to vector<2x8x8xf32>
    %5 = arith.cmpf oeq, %3, %4 : vector<2x8x8xf32>
    %cst_5 = arith.constant -1.000000e+09 : f32
    %cst_6 = arith.constant 0.000000e+00 : f32
    %6 = vector.broadcast %cst_5 : f32 to vector<2x8x8xf32>
    %7 = vector.broadcast %cst_6 : f32 to vector<2x8x8xf32>
    %8 = arith.select %5, %6, %7 : vector<2x8x8xi1>, vector<2x8x8xf32>
    %9 = vector.extract_strided_slice %2 {offsets = [0, 0, 8], sizes = [2, 8, 8], strides = [1, 1, 1]} : vector<2x8x16xf32> to vector<2x8x8xf32>
    %cst_7 = arith.constant 0.000000e+00 : f32
    %10 = vector.broadcast %cst_7 : f32 to vector<2x8x8xf32>
    %11 = arith.cmpf oeq, %9, %10 : vector<2x8x8xf32>
    %cst_8 = arith.constant -1.000000e+09 : f32
    %cst_9 = arith.constant 0.000000e+00 : f32
    %12 = vector.broadcast %cst_8 : f32 to vector<2x8x8xf32>
    %13 = vector.broadcast %cst_9 : f32 to vector<2x8x8xf32>
    %14 = arith.select %11, %12, %13 : vector<2x8x8xi1>, vector<2x8x8xf32>
    %c0_10 = arith.constant 0 : index
    %c192 = arith.constant 192 : index
    %15 = vector.load %arg2[%c0_10, %c192] : memref<32x384xbf16, #tpu.memory_space<vmem>>, vector<32x32xbf16>
    %c0_11 = arith.constant 0 : index
    %c224 = arith.constant 224 : index
    %16 = vector.load %arg2[%c0_11, %c224] : memref<32x384xbf16, #tpu.memory_space<vmem>>, vector<32x32xbf16>
    %cst_12 = arith.constant dense<0.000000e+00> : vector<16xf32>
    %17 = vector.multi_reduction <add>, %0, %cst_12 [1] : vector<16x32xf32> to vector<16xf32>
    %18 = vector.shape_cast %17 : vector<16xf32> to vector<16x1xf32>
    %cst_13 = arith.constant 3.200000e+01 : f32
    %19 = vector.broadcast %cst_13 : f32 to vector<16x1xf32>
    %20 = arith.divf %18, %19 : vector<16x1xf32>
    %21 = vector.broadcast %20 : vector<16x1xf32> to vector<16x32xf32>
    %22 = arith.subf %0, %21 : vector<16x32xf32>
    %23 = arith.mulf %22, %22 : vector<16x32xf32>
    %cst_14 = arith.constant dense<0.000000e+00> : vector<16xf32>
    %24 = vector.multi_reduction <add>, %23, %cst_14 [1] : vector<16x32xf32> to vector<16xf32>
    %25 = vector.shape_cast %24 : vector<16xf32> to vector<16x1xf32>
    %cst_15 = arith.constant 0.0322580636 : f32
    %26 = vector.broadcast %cst_15 : f32 to vector<16x1xf32>
    %27 = arith.mulf %25, %26 : vector<16x1xf32>
    %28 = vector.broadcast %20 : vector<16x1xf32> to vector<16x32xf32>
    %29 = arith.subf %0, %28 : vector<16x32xf32>
    %30 = math.sqrt %27 : vector<16x1xf32>
    %cst_16 = arith.constant 9.99999997E-7 : f32
    %31 = vector.broadcast %cst_16 : f32 to vector<16x1xf32>
    %32 = arith.addf %30, %31 : vector<16x1xf32>
    %33 = vector.broadcast %32 : vector<16x1xf32> to vector<16x32xf32>
    %34 = arith.divf %29, %33 : vector<16x32xf32>
    %35 = arith.truncf %34 : vector<16x32xf32> to vector<16x32xbf16>
    %c0_17 = arith.constant 0 : index
    %c0_18 = arith.constant 0 : index
    %36 = vector.load %arg2[%c0_17, %c0_18] : memref<32x384xbf16, #tpu.memory_space<vmem>>, vector<32x96xbf16>
    %cst_19 = arith.constant dense<0.000000e+00> : vector<16x96xf32>
    %37 = tpu.matmul %35, %36, %cst_19 {dimension_numbers = #tpu.dot_dimension_numbers<[1], [0], [0], [1], [0, 0, 1, 1], [], []>} : vector<16x32xbf16>, vector<32x96xbf16>, vector<16x96xf32> -> vector<16x96xf32>
    %c0_20 = arith.constant 0 : index
    %c0_21 = arith.constant 0 : index
    %38 = vector.load %arg3[%c0_20, %c0_21] : memref<8x128xf32, #tpu.memory_space<vmem>>, vector<1x96xf32>
    %39 = vector.broadcast %38 : vector<1x96xf32> to vector<16x96xf32>
    %40 = arith.addf %37, %39 : vector<16x96xf32>
    %41 = vector.extract_strided_slice %40 {offsets = [0, 0], sizes = [16, 32], strides = [1, 1]} : vector<16x96xf32> to vector<16x32xf32>
    %42 = vector.extract_strided_slice %40 {offsets = [0, 32], sizes = [16, 32], strides = [1, 1]} : vector<16x96xf32> to vector<16x32xf32>
    %43 = vector.extract_strided_slice %40 {offsets = [0, 64], sizes = [16, 32], strides = [1, 1]} : vector<16x96xf32> to vector<16x32xf32>
    %c3 = arith.constant 3 : index
    %c0_22 = arith.constant 0 : index
    %44 = vector.load %arg3[%c3, %c0_22] : memref<8x128xf32, #tpu.memory_space<vmem>>, vector<1x32xf32>
    %45 = arith.truncf %41 : vector<16x32xf32> to vector<16x32xbf16>
    %46 = vector.shape_cast %45 : vector<16x32xbf16> to vector<2x8x32xbf16>
    %47 = arith.truncf %42 : vector<16x32xf32> to vector<16x32xbf16>
    %48 = vector.shape_cast %47 : vector<16x32xbf16> to vector<2x8x32xbf16>
    %49 = arith.truncf %43 : vector<16x32xf32> to vector<16x32xbf16>
    %50 = vector.shape_cast %49 : vector<16x32xbf16> to vector<2x8x32xbf16>
    %cst_23 = arith.constant 0.000000e+00 : f32
    %51 = vector.broadcast %cst_23 : f32 to vector<16x32xf32>
    %52 = vector.extract_strided_slice %46 {offsets = [0, 0, 0], sizes = [2, 8, 8], strides = [1, 1, 1]} : vector<2x8x32xbf16> to vector<2x8x8xbf16>
    %53 = vector.extract_strided_slice %48 {offsets = [0, 0, 0], sizes = [2, 8, 8], strides = [1, 1, 1]} : vector<2x8x32xbf16> to vector<2x8x8xbf16>
    %54 = vector.extract_strided_slice %50 {offsets = [0, 0, 0], sizes = [2, 8, 8], strides = [1, 1, 1]} : vector<2x8x32xbf16> to vector<2x8x8xbf16>
    "tpu.trace_start"() <{level = 10 : i32, message = "bqd,bkd->bqk"}> : () -> ()
    %cst_24 = arith.constant dense<0.000000e+00> : vector<2x8x8xf32>
    %55 = tpu.matmul %52, %53, %cst_24 {dimension_numbers = #tpu.dot_dimension_numbers<[2], [2], [1], [1], [0, 0, 0, 1, 1, 1], [0], [0]>} : vector<2x8x8xbf16>, vector<2x8x8xbf16>, vector<2x8x8xf32> -> vector<2x8x8xf32>
    "tpu.trace_stop"() : () -> ()
    %56 = arith.addf %55, %8 : vector<2x8x8xf32>
    %cst_25 = arith.constant dense<0xFF800000> : vector<2x8xf32>
    %57 = vector.multi_reduction <maximumf>, %56, %cst_25 [2] : vector<2x8x8xf32> to vector<2x8xf32>
    %58 = vector.shape_cast %57 : vector<2x8xf32> to vector<2x8x1xf32>
    %59 = vector.broadcast %58 : vector<2x8x1xf32> to vector<2x8x8xf32>
    %60 = arith.subf %56, %59 : vector<2x8x8xf32>
    %61 = math.exp %60 : vector<2x8x8xf32>
    %cst_26 = arith.constant dense<0.000000e+00> : vector<2x8xf32>
    %62 = vector.multi_reduction <add>, %61, %cst_26 [2] : vector<2x8x8xf32> to vector<2x8xf32>
    %63 = vector.shape_cast %62 : vector<2x8xf32> to vector<2x8x1xf32>
    %64 = tpu.reciprocal %63 {approx = true} : vector<2x8x1xf32> -> vector<2x8x1xf32>
    %65 = vector.broadcast %64 : vector<2x8x1xf32> to vector<2x8x8xf32>
    %66 = arith.mulf %61, %65 : vector<2x8x8xf32>
    %67 = arith.truncf %66 : vector<2x8x8xf32> to vector<2x8x8xbf16>
    "tpu.trace_start"() <{level = 10 : i32, message = "bqk,bkd->bqd"}> : () -> ()
    %cst_27 = arith.constant dense<0.000000e+00> : vector<2x8x8xf32>
    %68 = tpu.matmul %67, %54, %cst_27 {dimension_numbers = #tpu.dot_dimension_numbers<[2], [1], [1], [2], [0, 0, 0, 1, 1, 2], [0], [0]>} : vector<2x8x8xbf16>, vector<2x8x8xbf16>, vector<2x8x8xf32> -> vector<2x8x8xf32>
    "tpu.trace_stop"() : () -> ()
    %69 = vector.shape_cast %68 : vector<2x8x8xf32> to vector<16x8xf32>
    %70 = arith.truncf %69 : vector<16x8xf32> to vector<16x8xbf16>
    %71 = vector.extract_strided_slice %15 {offsets = [0, 0], sizes = [8, 32], strides = [1, 1]} : vector<32x32xbf16> to vector<8x32xbf16>
    %cst_28 = arith.constant dense<0.000000e+00> : vector<16x32xf32>
    %72 = tpu.matmul %70, %71, %cst_28 {dimension_numbers = #tpu.dot_dimension_numbers<[1], [0], [0], [1], [0, 0, 1, 1], [], []>} : vector<16x8xbf16>, vector<8x32xbf16>, vector<16x32xf32> -> vector<16x32xf32>
    %73 = arith.addf %51, %72 : vector<16x32xf32>
    %74 = vector.extract_strided_slice %46 {offsets = [0, 0, 8], sizes = [2, 8, 8], strides = [1, 1, 1]} : vector<2x8x32xbf16> to vector<2x8x8xbf16>
    %75 = vector.extract_strided_slice %48 {offsets = [0, 0, 8], sizes = [2, 8, 8], strides = [1, 1, 1]} : vector<2x8x32xbf16> to vector<2x8x8xbf16>
    %76 = vector.extract_strided_slice %50 {offsets = [0, 0, 8], sizes = [2, 8, 8], strides = [1, 1, 1]} : vector<2x8x32xbf16> to vector<2x8x8xbf16>
    "tpu.trace_start"() <{level = 10 : i32, message = "bqd,bkd->bqk"}> : () -> ()
    %cst_29 = arith.constant dense<0.000000e+00> : vector<2x8x8xf32>
    %77 = tpu.matmul %74, %75, %cst_29 {dimension_numbers = #tpu.dot_dimension_numbers<[2], [2], [1], [1], [0, 0, 0, 1, 1, 1], [0], [0]>} : vector<2x8x8xbf16>, vector<2x8x8xbf16>, vector<2x8x8xf32> -> vector<2x8x8xf32>
    "tpu.trace_stop"() : () -> ()
    %78 = arith.addf %77, %8 : vector<2x8x8xf32>
    %cst_30 = arith.constant dense<0xFF800000> : vector<2x8xf32>
    %79 = vector.multi_reduction <maximumf>, %78, %cst_30 [2] : vector<2x8x8xf32> to vector<2x8xf32>
    %80 = vector.shape_cast %79 : vector<2x8xf32> to vector<2x8x1xf32>
    %81 = vector.broadcast %80 : vector<2x8x1xf32> to vector<2x8x8xf32>
    %82 = arith.subf %78, %81 : vector<2x8x8xf32>
    %83 = math.exp %82 : vector<2x8x8xf32>
    %cst_31 = arith.constant dense<0.000000e+00> : vector<2x8xf32>
    %84 = vector.multi_reduction <add>, %83, %cst_31 [2] : vector<2x8x8xf32> to vector<2x8xf32>
    %85 = vector.shape_cast %84 : vector<2x8xf32> to vector<2x8x1xf32>
    %86 = tpu.reciprocal %85 {approx = true} : vector<2x8x1xf32> -> vector<2x8x1xf32>
    %87 = vector.broadcast %86 : vector<2x8x1xf32> to vector<2x8x8xf32>
    %88 = arith.mulf %83, %87 : vector<2x8x8xf32>
    %89 = arith.truncf %88 : vector<2x8x8xf32> to vector<2x8x8xbf16>
    "tpu.trace_start"() <{level = 10 : i32, message = "bqk,bkd->bqd"}> : () -> ()
    %cst_32 = arith.constant dense<0.000000e+00> : vector<2x8x8xf32>
    %90 = tpu.matmul %89, %76, %cst_32 {dimension_numbers = #tpu.dot_dimension_numbers<[2], [1], [1], [2], [0, 0, 0, 1, 1, 2], [0], [0]>} : vector<2x8x8xbf16>, vector<2x8x8xbf16>, vector<2x8x8xf32> -> vector<2x8x8xf32>
    "tpu.trace_stop"() : () -> ()
    %91 = vector.shape_cast %90 : vector<2x8x8xf32> to vector<16x8xf32>
    %92 = arith.truncf %91 : vector<16x8xf32> to vector<16x8xbf16>
    %93 = vector.extract_strided_slice %15 {offsets = [8, 0], sizes = [8, 32], strides = [1, 1]} : vector<32x32xbf16> to vector<8x32xbf16>
    %cst_33 = arith.constant dense<0.000000e+00> : vector<16x32xf32>
    %94 = tpu.matmul %92, %93, %cst_33 {dimension_numbers = #tpu.dot_dimension_numbers<[1], [0], [0], [1], [0, 0, 1, 1], [], []>} : vector<16x8xbf16>, vector<8x32xbf16>, vector<16x32xf32> -> vector<16x32xf32>
    %95 = arith.addf %73, %94 : vector<16x32xf32>
    %96 = vector.extract_strided_slice %46 {offsets = [0, 0, 16], sizes = [2, 8, 8], strides = [1, 1, 1]} : vector<2x8x32xbf16> to vector<2x8x8xbf16>
    %97 = vector.extract_strided_slice %48 {offsets = [0, 0, 16], sizes = [2, 8, 8], strides = [1, 1, 1]} : vector<2x8x32xbf16> to vector<2x8x8xbf16>
    %98 = vector.extract_strided_slice %50 {offsets = [0, 0, 16], sizes = [2, 8, 8], strides = [1, 1, 1]} : vector<2x8x32xbf16> to vector<2x8x8xbf16>
    "tpu.trace_start"() <{level = 10 : i32, message = "bqd,bkd->bqk"}> : () -> ()
    %cst_34 = arith.constant dense<0.000000e+00> : vector<2x8x8xf32>
    %99 = tpu.matmul %96, %97, %cst_34 {dimension_numbers = #tpu.dot_dimension_numbers<[2], [2], [1], [1], [0, 0, 0, 1, 1, 1], [0], [0]>} : vector<2x8x8xbf16>, vector<2x8x8xbf16>, vector<2x8x8xf32> -> vector<2x8x8xf32>
    "tpu.trace_stop"() : () -> ()
    %100 = arith.addf %99, %8 : vector<2x8x8xf32>
    %cst_35 = arith.constant dense<0xFF800000> : vector<2x8xf32>
    %101 = vector.multi_reduction <maximumf>, %100, %cst_35 [2] : vector<2x8x8xf32> to vector<2x8xf32>
    %102 = vector.shape_cast %101 : vector<2x8xf32> to vector<2x8x1xf32>
    %103 = vector.broadcast %102 : vector<2x8x1xf32> to vector<2x8x8xf32>
    %104 = arith.subf %100, %103 : vector<2x8x8xf32>
    %105 = math.exp %104 : vector<2x8x8xf32>
    %cst_36 = arith.constant dense<0.000000e+00> : vector<2x8xf32>
    %106 = vector.multi_reduction <add>, %105, %cst_36 [2] : vector<2x8x8xf32> to vector<2x8xf32>
    %107 = vector.shape_cast %106 : vector<2x8xf32> to vector<2x8x1xf32>
    %108 = tpu.reciprocal %107 {approx = true} : vector<2x8x1xf32> -> vector<2x8x1xf32>
    %109 = vector.broadcast %108 : vector<2x8x1xf32> to vector<2x8x8xf32>
    %110 = arith.mulf %105, %109 : vector<2x8x8xf32>
    %111 = arith.truncf %110 : vector<2x8x8xf32> to vector<2x8x8xbf16>
    "tpu.trace_start"() <{level = 10 : i32, message = "bqk,bkd->bqd"}> : () -> ()
    %cst_37 = arith.constant dense<0.000000e+00> : vector<2x8x8xf32>
    %112 = tpu.matmul %111, %98, %cst_37 {dimension_numbers = #tpu.dot_dimension_numbers<[2], [1], [1], [2], [0, 0, 0, 1, 1, 2], [0], [0]>} : vector<2x8x8xbf16>, vector<2x8x8xbf16>, vector<2x8x8xf32> -> vector<2x8x8xf32>
    "tpu.trace_stop"() : () -> ()
    %113 = vector.shape_cast %112 : vector<2x8x8xf32> to vector<16x8xf32>
    %114 = arith.truncf %113 : vector<16x8xf32> to vector<16x8xbf16>
    %115 = vector.extract_strided_slice %15 {offsets = [16, 0], sizes = [8, 32], strides = [1, 1]} : vector<32x32xbf16> to vector<8x32xbf16>
    %cst_38 = arith.constant dense<0.000000e+00> : vector<16x32xf32>
    %116 = tpu.matmul %114, %115, %cst_38 {dimension_numbers = #tpu.dot_dimension_numbers<[1], [0], [0], [1], [0, 0, 1, 1], [], []>} : vector<16x8xbf16>, vector<8x32xbf16>, vector<16x32xf32> -> vector<16x32xf32>
    %117 = arith.addf %95, %116 : vector<16x32xf32>
    %118 = vector.extract_strided_slice %46 {offsets = [0, 0, 24], sizes = [2, 8, 8], strides = [1, 1, 1]} : vector<2x8x32xbf16> to vector<2x8x8xbf16>
    %119 = vector.extract_strided_slice %48 {offsets = [0, 0, 24], sizes = [2, 8, 8], strides = [1, 1, 1]} : vector<2x8x32xbf16> to vector<2x8x8xbf16>
    %120 = vector.extract_strided_slice %50 {offsets = [0, 0, 24], sizes = [2, 8, 8], strides = [1, 1, 1]} : vector<2x8x32xbf16> to vector<2x8x8xbf16>
    "tpu.trace_start"() <{level = 10 : i32, message = "bqd,bkd->bqk"}> : () -> ()
    %cst_39 = arith.constant dense<0.000000e+00> : vector<2x8x8xf32>
    %121 = tpu.matmul %118, %119, %cst_39 {dimension_numbers = #tpu.dot_dimension_numbers<[2], [2], [1], [1], [0, 0, 0, 1, 1, 1], [0], [0]>} : vector<2x8x8xbf16>, vector<2x8x8xbf16>, vector<2x8x8xf32> -> vector<2x8x8xf32>
    "tpu.trace_stop"() : () -> ()
    %122 = arith.addf %121, %8 : vector<2x8x8xf32>
    %cst_40 = arith.constant dense<0xFF800000> : vector<2x8xf32>
    %123 = vector.multi_reduction <maximumf>, %122, %cst_40 [2] : vector<2x8x8xf32> to vector<2x8xf32>
    %124 = vector.shape_cast %123 : vector<2x8xf32> to vector<2x8x1xf32>
    %125 = vector.broadcast %124 : vector<2x8x1xf32> to vector<2x8x8xf32>
    %126 = arith.subf %122, %125 : vector<2x8x8xf32>
    %127 = math.exp %126 : vector<2x8x8xf32>
    %cst_41 = arith.constant dense<0.000000e+00> : vector<2x8xf32>
    %128 = vector.multi_reduction <add>, %127, %cst_41 [2] : vector<2x8x8xf32> to vector<2x8xf32>
    %129 = vector.shape_cast %128 : vector<2x8xf32> to vector<2x8x1xf32>
    %130 = tpu.reciprocal %129 {approx = true} : vector<2x8x1xf32> -> vector<2x8x1xf32>
    %131 = vector.broadcast %130 : vector<2x8x1xf32> to vector<2x8x8xf32>
    %132 = arith.mulf %127, %131 : vector<2x8x8xf32>
    %133 = arith.truncf %132 : vector<2x8x8xf32> to vector<2x8x8xbf16>
    "tpu.trace_start"() <{level = 10 : i32, message = "bqk,bkd->bqd"}> : () -> ()
    %cst_42 = arith.constant dense<0.000000e+00> : vector<2x8x8xf32>
    %134 = tpu.matmul %133, %120, %cst_42 {dimension_numbers = #tpu.dot_dimension_numbers<[2], [1], [1], [2], [0, 0, 0, 1, 1, 2], [0], [0]>} : vector<2x8x8xbf16>, vector<2x8x8xbf16>, vector<2x8x8xf32> -> vector<2x8x8xf32>
    "tpu.trace_stop"() : () -> ()
    %135 = vector.shape_cast %134 : vector<2x8x8xf32> to vector<16x8xf32>
    %136 = arith.truncf %135 : vector<16x8xf32> to vector<16x8xbf16>
    %137 = vector.extract_strided_slice %15 {offsets = [24, 0], sizes = [8, 32], strides = [1, 1]} : vector<32x32xbf16> to vector<8x32xbf16>
    %cst_43 = arith.constant dense<0.000000e+00> : vector<16x32xf32>
    %138 = tpu.matmul %136, %137, %cst_43 {dimension_numbers = #tpu.dot_dimension_numbers<[1], [0], [0], [1], [0, 0, 1, 1], [], []>} : vector<16x8xbf16>, vector<8x32xbf16>, vector<16x32xf32> -> vector<16x32xf32>
    %139 = arith.addf %117, %138 : vector<16x32xf32>
    %140 = vector.broadcast %44 : vector<1x32xf32> to vector<16x32xf32>
    %141 = arith.addf %139, %140 : vector<16x32xf32>
    %142 = arith.addf %0, %141 : vector<16x32xf32>
    %cst_44 = arith.constant dense<0.000000e+00> : vector<16xf32>
    %143 = vector.multi_reduction <add>, %142, %cst_44 [1] : vector<16x32xf32> to vector<16xf32>
    %144 = vector.shape_cast %143 : vector<16xf32> to vector<16x1xf32>
    %cst_45 = arith.constant 3.200000e+01 : f32
    %145 = vector.broadcast %cst_45 : f32 to vector<16x1xf32>
    %146 = arith.divf %144, %145 : vector<16x1xf32>
    %147 = vector.broadcast %146 : vector<16x1xf32> to vector<16x32xf32>
    %148 = arith.subf %142, %147 : vector<16x32xf32>
    %149 = arith.mulf %148, %148 : vector<16x32xf32>
    %cst_46 = arith.constant dense<0.000000e+00> : vector<16xf32>
    %150 = vector.multi_reduction <add>, %149, %cst_46 [1] : vector<16x32xf32> to vector<16xf32>
    %151 = vector.shape_cast %150 : vector<16xf32> to vector<16x1xf32>
    %cst_47 = arith.constant 0.0322580636 : f32
    %152 = vector.broadcast %cst_47 : f32 to vector<16x1xf32>
    %153 = arith.mulf %151, %152 : vector<16x1xf32>
    %154 = vector.broadcast %146 : vector<16x1xf32> to vector<16x32xf32>
    %155 = arith.subf %142, %154 : vector<16x32xf32>
    %156 = math.sqrt %153 : vector<16x1xf32>
    %cst_48 = arith.constant 9.99999997E-7 : f32
    %157 = vector.broadcast %cst_48 : f32 to vector<16x1xf32>
    %158 = arith.addf %156, %157 : vector<16x1xf32>
    %159 = vector.broadcast %158 : vector<16x1xf32> to vector<16x32xf32>
    %160 = arith.divf %155, %159 : vector<16x32xf32>
    %161 = arith.truncf %160 : vector<16x32xf32> to vector<16x32xbf16>
    %c0_49 = arith.constant 0 : index
    %c96 = arith.constant 96 : index
    %162 = vector.load %arg2[%c0_49, %c96] : memref<32x384xbf16, #tpu.memory_space<vmem>>, vector<32x32xbf16>
    %cst_50 = arith.constant dense<0.000000e+00> : vector<16x32xf32>
    %163 = tpu.matmul %161, %162, %cst_50 {dimension_numbers = #tpu.dot_dimension_numbers<[1], [0], [0], [1], [0, 0, 1, 1], [], []>} : vector<16x32xbf16>, vector<32x32xbf16>, vector<16x32xf32> -> vector<16x32xf32>
    %c1 = arith.constant 1 : index
    %c0_51 = arith.constant 0 : index
    %164 = vector.load %arg3[%c1, %c0_51] : memref<8x128xf32, #tpu.memory_space<vmem>>, vector<1x32xf32>
    %165 = vector.broadcast %164 : vector<1x32xf32> to vector<16x32xf32>
    %166 = arith.addf %163, %165 : vector<16x32xf32>
    %167 = arith.truncf %1 : vector<16x32xf32> to vector<16x32xbf16>
    %c0_52 = arith.constant 0 : index
    %c128 = arith.constant 128 : index
    %168 = vector.load %arg2[%c0_52, %c128] : memref<32x384xbf16, #tpu.memory_space<vmem>>, vector<32x64xbf16>
    %cst_53 = arith.constant dense<0.000000e+00> : vector<16x64xf32>
    %169 = tpu.matmul %167, %168, %cst_53 {dimension_numbers = #tpu.dot_dimension_numbers<[1], [0], [0], [1], [0, 0, 1, 1], [], []>} : vector<16x32xbf16>, vector<32x64xbf16>, vector<16x64xf32> -> vector<16x64xf32>
    %c2 = arith.constant 2 : index
    %c0_54 = arith.constant 0 : index
    %170 = vector.load %arg3[%c2, %c0_54] : memref<8x128xf32, #tpu.memory_space<vmem>>, vector<1x64xf32>
    %171 = vector.broadcast %170 : vector<1x64xf32> to vector<16x64xf32>
    %172 = arith.addf %169, %171 : vector<16x64xf32>
    %173 = vector.extract_strided_slice %172 {offsets = [0, 0], sizes = [16, 32], strides = [1, 1]} : vector<16x64xf32> to vector<16x32xf32>
    %174 = vector.extract_strided_slice %172 {offsets = [0, 32], sizes = [16, 32], strides = [1, 1]} : vector<16x64xf32> to vector<16x32xf32>
    %c4 = arith.constant 4 : index
    %c0_55 = arith.constant 0 : index
    %175 = vector.load %arg3[%c4, %c0_55] : memref<8x128xf32, #tpu.memory_space<vmem>>, vector<1x32xf32>
    %176 = arith.truncf %166 : vector<16x32xf32> to vector<16x32xbf16>
    %177 = vector.shape_cast %176 : vector<16x32xbf16> to vector<2x8x32xbf16>
    %178 = arith.truncf %173 : vector<16x32xf32> to vector<16x32xbf16>
    %179 = vector.shape_cast %178 : vector<16x32xbf16> to vector<2x8x32xbf16>
    %180 = arith.truncf %174 : vector<16x32xf32> to vector<16x32xbf16>
    %181 = vector.shape_cast %180 : vector<16x32xbf16> to vector<2x8x32xbf16>
    %cst_56 = arith.constant 0.000000e+00 : f32
    %182 = vector.broadcast %cst_56 : f32 to vector<16x32xf32>
    %183 = vector.extract_strided_slice %177 {offsets = [0, 0, 0], sizes = [2, 8, 8], strides = [1, 1, 1]} : vector<2x8x32xbf16> to vector<2x8x8xbf16>
    %184 = vector.extract_strided_slice %179 {offsets = [0, 0, 0], sizes = [2, 8, 8], strides = [1, 1, 1]} : vector<2x8x32xbf16> to vector<2x8x8xbf16>
    %185 = vector.extract_strided_slice %181 {offsets = [0, 0, 0], sizes = [2, 8, 8], strides = [1, 1, 1]} : vector<2x8x32xbf16> to vector<2x8x8xbf16>
    "tpu.trace_start"() <{level = 10 : i32, message = "bqd,bkd->bqk"}> : () -> ()
    %cst_57 = arith.constant dense<0.000000e+00> : vector<2x8x8xf32>
    %186 = tpu.matmul %183, %184, %cst_57 {dimension_numbers = #tpu.dot_dimension_numbers<[2], [2], [1], [1], [0, 0, 0, 1, 1, 1], [0], [0]>} : vector<2x8x8xbf16>, vector<2x8x8xbf16>, vector<2x8x8xf32> -> vector<2x8x8xf32>
    "tpu.trace_stop"() : () -> ()
    %187 = arith.addf %186, %14 : vector<2x8x8xf32>
    %cst_58 = arith.constant dense<0xFF800000> : vector<2x8xf32>
    %188 = vector.multi_reduction <maximumf>, %187, %cst_58 [2] : vector<2x8x8xf32> to vector<2x8xf32>
    %189 = vector.shape_cast %188 : vector<2x8xf32> to vector<2x8x1xf32>
    %190 = vector.broadcast %189 : vector<2x8x1xf32> to vector<2x8x8xf32>
    %191 = arith.subf %187, %190 : vector<2x8x8xf32>
    %192 = math.exp %191 : vector<2x8x8xf32>
    %cst_59 = arith.constant dense<0.000000e+00> : vector<2x8xf32>
    %193 = vector.multi_reduction <add>, %192, %cst_59 [2] : vector<2x8x8xf32> to vector<2x8xf32>
    %194 = vector.shape_cast %193 : vector<2x8xf32> to vector<2x8x1xf32>
    %195 = tpu.reciprocal %194 {approx = true} : vector<2x8x1xf32> -> vector<2x8x1xf32>
    %196 = vector.broadcast %195 : vector<2x8x1xf32> to vector<2x8x8xf32>
    %197 = arith.mulf %192, %196 : vector<2x8x8xf32>
    %198 = arith.truncf %197 : vector<2x8x8xf32> to vector<2x8x8xbf16>
    "tpu.trace_start"() <{level = 10 : i32, message = "bqk,bkd->bqd"}> : () -> ()
    %cst_60 = arith.constant dense<0.000000e+00> : vector<2x8x8xf32>
    %199 = tpu.matmul %198, %185, %cst_60 {dimension_numbers = #tpu.dot_dimension_numbers<[2], [1], [1], [2], [0, 0, 0, 1, 1, 2], [0], [0]>} : vector<2x8x8xbf16>, vector<2x8x8xbf16>, vector<2x8x8xf32> -> vector<2x8x8xf32>
    "tpu.trace_stop"() : () -> ()
    %200 = vector.shape_cast %199 : vector<2x8x8xf32> to vector<16x8xf32>
    %201 = arith.truncf %200 : vector<16x8xf32> to vector<16x8xbf16>
    %202 = vector.extract_strided_slice %16 {offsets = [0, 0], sizes = [8, 32], strides = [1, 1]} : vector<32x32xbf16> to vector<8x32xbf16>
    %cst_61 = arith.constant dense<0.000000e+00> : vector<16x32xf32>
    %203 = tpu.matmul %201, %202, %cst_61 {dimension_numbers = #tpu.dot_dimension_numbers<[1], [0], [0], [1], [0, 0, 1, 1], [], []>} : vector<16x8xbf16>, vector<8x32xbf16>, vector<16x32xf32> -> vector<16x32xf32>
    %204 = arith.addf %182, %203 : vector<16x32xf32>
    %205 = vector.extract_strided_slice %177 {offsets = [0, 0, 8], sizes = [2, 8, 8], strides = [1, 1, 1]} : vector<2x8x32xbf16> to vector<2x8x8xbf16>
    %206 = vector.extract_strided_slice %179 {offsets = [0, 0, 8], sizes = [2, 8, 8], strides = [1, 1, 1]} : vector<2x8x32xbf16> to vector<2x8x8xbf16>
    %207 = vector.extract_strided_slice %181 {offsets = [0, 0, 8], sizes = [2, 8, 8], strides = [1, 1, 1]} : vector<2x8x32xbf16> to vector<2x8x8xbf16>
    "tpu.trace_start"() <{level = 10 : i32, message = "bqd,bkd->bqk"}> : () -> ()
    %cst_62 = arith.constant dense<0.000000e+00> : vector<2x8x8xf32>
    %208 = tpu.matmul %205, %206, %cst_62 {dimension_numbers = #tpu.dot_dimension_numbers<[2], [2], [1], [1], [0, 0, 0, 1, 1, 1], [0], [0]>} : vector<2x8x8xbf16>, vector<2x8x8xbf16>, vector<2x8x8xf32> -> vector<2x8x8xf32>
    "tpu.trace_stop"() : () -> ()
    %209 = arith.addf %208, %14 : vector<2x8x8xf32>
    %cst_63 = arith.constant dense<0xFF800000> : vector<2x8xf32>
    %210 = vector.multi_reduction <maximumf>, %209, %cst_63 [2] : vector<2x8x8xf32> to vector<2x8xf32>
    %211 = vector.shape_cast %210 : vector<2x8xf32> to vector<2x8x1xf32>
    %212 = vector.broadcast %211 : vector<2x8x1xf32> to vector<2x8x8xf32>
    %213 = arith.subf %209, %212 : vector<2x8x8xf32>
    %214 = math.exp %213 : vector<2x8x8xf32>
    %cst_64 = arith.constant dense<0.000000e+00> : vector<2x8xf32>
    %215 = vector.multi_reduction <add>, %214, %cst_64 [2] : vector<2x8x8xf32> to vector<2x8xf32>
    %216 = vector.shape_cast %215 : vector<2x8xf32> to vector<2x8x1xf32>
    %217 = tpu.reciprocal %216 {approx = true} : vector<2x8x1xf32> -> vector<2x8x1xf32>
    %218 = vector.broadcast %217 : vector<2x8x1xf32> to vector<2x8x8xf32>
    %219 = arith.mulf %214, %218 : vector<2x8x8xf32>
    %220 = arith.truncf %219 : vector<2x8x8xf32> to vector<2x8x8xbf16>
    "tpu.trace_start"() <{level = 10 : i32, message = "bqk,bkd->bqd"}> : () -> ()
    %cst_65 = arith.constant dense<0.000000e+00> : vector<2x8x8xf32>
    %221 = tpu.matmul %220, %207, %cst_65 {dimension_numbers = #tpu.dot_dimension_numbers<[2], [1], [1], [2], [0, 0, 0, 1, 1, 2], [0], [0]>} : vector<2x8x8xbf16>, vector<2x8x8xbf16>, vector<2x8x8xf32> -> vector<2x8x8xf32>
    "tpu.trace_stop"() : () -> ()
    %222 = vector.shape_cast %221 : vector<2x8x8xf32> to vector<16x8xf32>
    %223 = arith.truncf %222 : vector<16x8xf32> to vector<16x8xbf16>
    %224 = vector.extract_strided_slice %16 {offsets = [8, 0], sizes = [8, 32], strides = [1, 1]} : vector<32x32xbf16> to vector<8x32xbf16>
    %cst_66 = arith.constant dense<0.000000e+00> : vector<16x32xf32>
    %225 = tpu.matmul %223, %224, %cst_66 {dimension_numbers = #tpu.dot_dimension_numbers<[1], [0], [0], [1], [0, 0, 1, 1], [], []>} : vector<16x8xbf16>, vector<8x32xbf16>, vector<16x32xf32> -> vector<16x32xf32>
    %226 = arith.addf %204, %225 : vector<16x32xf32>
    %227 = vector.extract_strided_slice %177 {offsets = [0, 0, 16], sizes = [2, 8, 8], strides = [1, 1, 1]} : vector<2x8x32xbf16> to vector<2x8x8xbf16>
    %228 = vector.extract_strided_slice %179 {offsets = [0, 0, 16], sizes = [2, 8, 8], strides = [1, 1, 1]} : vector<2x8x32xbf16> to vector<2x8x8xbf16>
    %229 = vector.extract_strided_slice %181 {offsets = [0, 0, 16], sizes = [2, 8, 8], strides = [1, 1, 1]} : vector<2x8x32xbf16> to vector<2x8x8xbf16>
    "tpu.trace_start"() <{level = 10 : i32, message = "bqd,bkd->bqk"}> : () -> ()
    %cst_67 = arith.constant dense<0.000000e+00> : vector<2x8x8xf32>
    %230 = tpu.matmul %227, %228, %cst_67 {dimension_numbers = #tpu.dot_dimension_numbers<[2], [2], [1], [1], [0, 0, 0, 1, 1, 1], [0], [0]>} : vector<2x8x8xbf16>, vector<2x8x8xbf16>, vector<2x8x8xf32> -> vector<2x8x8xf32>
    "tpu.trace_stop"() : () -> ()
    %231 = arith.addf %230, %14 : vector<2x8x8xf32>
    %cst_68 = arith.constant dense<0xFF800000> : vector<2x8xf32>
    %232 = vector.multi_reduction <maximumf>, %231, %cst_68 [2] : vector<2x8x8xf32> to vector<2x8xf32>
    %233 = vector.shape_cast %232 : vector<2x8xf32> to vector<2x8x1xf32>
    %234 = vector.broadcast %233 : vector<2x8x1xf32> to vector<2x8x8xf32>
    %235 = arith.subf %231, %234 : vector<2x8x8xf32>
    %236 = math.exp %235 : vector<2x8x8xf32>
    %cst_69 = arith.constant dense<0.000000e+00> : vector<2x8xf32>
    %237 = vector.multi_reduction <add>, %236, %cst_69 [2] : vector<2x8x8xf32> to vector<2x8xf32>
    %238 = vector.shape_cast %237 : vector<2x8xf32> to vector<2x8x1xf32>
    %239 = tpu.reciprocal %238 {approx = true} : vector<2x8x1xf32> -> vector<2x8x1xf32>
    %240 = vector.broadcast %239 : vector<2x8x1xf32> to vector<2x8x8xf32>
    %241 = arith.mulf %236, %240 : vector<2x8x8xf32>
    %242 = arith.truncf %241 : vector<2x8x8xf32> to vector<2x8x8xbf16>
    "tpu.trace_start"() <{level = 10 : i32, message = "bqk,bkd->bqd"}> : () -> ()
    %cst_70 = arith.constant dense<0.000000e+00> : vector<2x8x8xf32>
    %243 = tpu.matmul %242, %229, %cst_70 {dimension_numbers = #tpu.dot_dimension_numbers<[2], [1], [1], [2], [0, 0, 0, 1, 1, 2], [0], [0]>} : vector<2x8x8xbf16>, vector<2x8x8xbf16>, vector<2x8x8xf32> -> vector<2x8x8xf32>
    "tpu.trace_stop"() : () -> ()
    %244 = vector.shape_cast %243 : vector<2x8x8xf32> to vector<16x8xf32>
    %245 = arith.truncf %244 : vector<16x8xf32> to vector<16x8xbf16>
    %246 = vector.extract_strided_slice %16 {offsets = [16, 0], sizes = [8, 32], strides = [1, 1]} : vector<32x32xbf16> to vector<8x32xbf16>
    %cst_71 = arith.constant dense<0.000000e+00> : vector<16x32xf32>
    %247 = tpu.matmul %245, %246, %cst_71 {dimension_numbers = #tpu.dot_dimension_numbers<[1], [0], [0], [1], [0, 0, 1, 1], [], []>} : vector<16x8xbf16>, vector<8x32xbf16>, vector<16x32xf32> -> vector<16x32xf32>
    %248 = arith.addf %226, %247 : vector<16x32xf32>
    %249 = vector.extract_strided_slice %177 {offsets = [0, 0, 24], sizes = [2, 8, 8], strides = [1, 1, 1]} : vector<2x8x32xbf16> to vector<2x8x8xbf16>
    %250 = vector.extract_strided_slice %179 {offsets = [0, 0, 24], sizes = [2, 8, 8], strides = [1, 1, 1]} : vector<2x8x32xbf16> to vector<2x8x8xbf16>
    %251 = vector.extract_strided_slice %181 {offsets = [0, 0, 24], sizes = [2, 8, 8], strides = [1, 1, 1]} : vector<2x8x32xbf16> to vector<2x8x8xbf16>
    "tpu.trace_start"() <{level = 10 : i32, message = "bqd,bkd->bqk"}> : () -> ()
    %cst_72 = arith.constant dense<0.000000e+00> : vector<2x8x8xf32>
    %252 = tpu.matmul %249, %250, %cst_72 {dimension_numbers = #tpu.dot_dimension_numbers<[2], [2], [1], [1], [0, 0, 0, 1, 1, 1], [0], [0]>} : vector<2x8x8xbf16>, vector<2x8x8xbf16>, vector<2x8x8xf32> -> vector<2x8x8xf32>
    "tpu.trace_stop"() : () -> ()
    %253 = arith.addf %252, %14 : vector<2x8x8xf32>
    %cst_73 = arith.constant dense<0xFF800000> : vector<2x8xf32>
    %254 = vector.multi_reduction <maximumf>, %253, %cst_73 [2] : vector<2x8x8xf32> to vector<2x8xf32>
    %255 = vector.shape_cast %254 : vector<2x8xf32> to vector<2x8x1xf32>
    %256 = vector.broadcast %255 : vector<2x8x1xf32> to vector<2x8x8xf32>
    %257 = arith.subf %253, %256 : vector<2x8x8xf32>
    %258 = math.exp %257 : vector<2x8x8xf32>
    %cst_74 = arith.constant dense<0.000000e+00> : vector<2x8xf32>
    %259 = vector.multi_reduction <add>, %258, %cst_74 [2] : vector<2x8x8xf32> to vector<2x8xf32>
    %260 = vector.shape_cast %259 : vector<2x8xf32> to vector<2x8x1xf32>
    %261 = tpu.reciprocal %260 {approx = true} : vector<2x8x1xf32> -> vector<2x8x1xf32>
    %262 = vector.broadcast %261 : vector<2x8x1xf32> to vector<2x8x8xf32>
    %263 = arith.mulf %258, %262 : vector<2x8x8xf32>
    %264 = arith.truncf %263 : vector<2x8x8xf32> to vector<2x8x8xbf16>
    "tpu.trace_start"() <{level = 10 : i32, message = "bqk,bkd->bqd"}> : () -> ()
    %cst_75 = arith.constant dense<0.000000e+00> : vector<2x8x8xf32>
    %265 = tpu.matmul %264, %251, %cst_75 {dimension_numbers = #tpu.dot_dimension_numbers<[2], [1], [1], [2], [0, 0, 0, 1, 1, 2], [0], [0]>} : vector<2x8x8xbf16>, vector<2x8x8xbf16>, vector<2x8x8xf32> -> vector<2x8x8xf32>
    "tpu.trace_stop"() : () -> ()
    %266 = vector.shape_cast %265 : vector<2x8x8xf32> to vector<16x8xf32>
    %267 = arith.truncf %266 : vector<16x8xf32> to vector<16x8xbf16>
    %268 = vector.extract_strided_slice %16 {offsets = [24, 0], sizes = [8, 32], strides = [1, 1]} : vector<32x32xbf16> to vector<8x32xbf16>
    %cst_76 = arith.constant dense<0.000000e+00> : vector<16x32xf32>
    %269 = tpu.matmul %267, %268, %cst_76 {dimension_numbers = #tpu.dot_dimension_numbers<[1], [0], [0], [1], [0, 0, 1, 1], [], []>} : vector<16x8xbf16>, vector<8x32xbf16>, vector<16x32xf32> -> vector<16x32xf32>
    %270 = arith.addf %248, %269 : vector<16x32xf32>
    %271 = vector.broadcast %175 : vector<1x32xf32> to vector<16x32xf32>
    %272 = arith.addf %270, %271 : vector<16x32xf32>
    %273 = arith.addf %142, %272 : vector<16x32xf32>
    %cst_77 = arith.constant dense<0.000000e+00> : vector<16xf32>
    %274 = vector.multi_reduction <add>, %273, %cst_77 [1] : vector<16x32xf32> to vector<16xf32>
    %275 = vector.shape_cast %274 : vector<16xf32> to vector<16x1xf32>
    %cst_78 = arith.constant 3.200000e+01 : f32
    %276 = vector.broadcast %cst_78 : f32 to vector<16x1xf32>
    %277 = arith.divf %275, %276 : vector<16x1xf32>
    %278 = vector.broadcast %277 : vector<16x1xf32> to vector<16x32xf32>
    %279 = arith.subf %273, %278 : vector<16x32xf32>
    %280 = arith.mulf %279, %279 : vector<16x32xf32>
    %cst_79 = arith.constant dense<0.000000e+00> : vector<16xf32>
    %281 = vector.multi_reduction <add>, %280, %cst_79 [1] : vector<16x32xf32> to vector<16xf32>
    %282 = vector.shape_cast %281 : vector<16xf32> to vector<16x1xf32>
    %cst_80 = arith.constant 0.0322580636 : f32
    %283 = vector.broadcast %cst_80 : f32 to vector<16x1xf32>
    %284 = arith.mulf %282, %283 : vector<16x1xf32>
    %285 = vector.broadcast %277 : vector<16x1xf32> to vector<16x32xf32>
    %286 = arith.subf %273, %285 : vector<16x32xf32>
    %287 = math.sqrt %284 : vector<16x1xf32>
    %cst_81 = arith.constant 9.99999997E-7 : f32
    %288 = vector.broadcast %cst_81 : f32 to vector<16x1xf32>
    %289 = arith.addf %287, %288 : vector<16x1xf32>
    %290 = vector.broadcast %289 : vector<16x1xf32> to vector<16x32xf32>
    %291 = arith.divf %286, %290 : vector<16x32xf32>
    %292 = arith.truncf %291 : vector<16x32xf32> to vector<16x32xbf16>
    %c0_82 = arith.constant 0 : index
    %c256 = arith.constant 256 : index
    %293 = vector.load %arg2[%c0_82, %c256] : memref<32x384xbf16, #tpu.memory_space<vmem>>, vector<32x64xbf16>
    %cst_83 = arith.constant dense<0.000000e+00> : vector<16x64xf32>
    %294 = tpu.matmul %292, %293, %cst_83 {dimension_numbers = #tpu.dot_dimension_numbers<[1], [0], [0], [1], [0, 0, 1, 1], [], []>} : vector<16x32xbf16>, vector<32x64xbf16>, vector<16x64xf32> -> vector<16x64xf32>
    %c5 = arith.constant 5 : index
    %c0_84 = arith.constant 0 : index
    %295 = vector.load %arg3[%c5, %c0_84] : memref<8x128xf32, #tpu.memory_space<vmem>>, vector<1x64xf32>
    %296 = vector.broadcast %295 : vector<1x64xf32> to vector<16x64xf32>
    %297 = arith.addf %294, %296 : vector<16x64xf32>
    %cst_85 = arith.constant 0.000000e+00 : f32
    %298 = vector.broadcast %cst_85 : f32 to vector<16x64xf32>
    %299 = arith.maximumf %297, %298 : vector<16x64xf32>
    %300 = arith.truncf %299 : vector<16x64xf32> to vector<16x64xbf16>
    %c0_86 = arith.constant 0 : index
    %c320 = arith.constant 320 : index
    %301 = vector.load %arg2[%c0_86, %c320] : memref<32x384xbf16, #tpu.memory_space<vmem>>, vector<32x64xbf16>
    "tpu.trace_start"() <{level = 10 : i32, message = "nf,df->nd"}> : () -> ()
    %cst_87 = arith.constant dense<0.000000e+00> : vector<16x32xf32>
    %302 = tpu.matmul %300, %301, %cst_87 {dimension_numbers = #tpu.dot_dimension_numbers<[1], [1], [0], [0], [0, 0, 1, 0], [], []>} : vector<16x64xbf16>, vector<32x64xbf16>, vector<16x32xf32> -> vector<16x32xf32>
    "tpu.trace_stop"() : () -> ()
    %c6 = arith.constant 6 : index
    %c0_88 = arith.constant 0 : index
    %303 = vector.load %arg3[%c6, %c0_88] : memref<8x128xf32, #tpu.memory_space<vmem>>, vector<1x32xf32>
    %304 = vector.broadcast %303 : vector<1x32xf32> to vector<16x32xf32>
    %305 = arith.addf %302, %304 : vector<16x32xf32>
    %306 = arith.addf %273, %305 : vector<16x32xf32>
    %c0_89 = arith.constant 0 : index
    %c0_90 = arith.constant 0 : index
    %307 = vector.load %arg4[%c0_89, %c0_90] : memref<16x32xf32, #tpu.memory_space<vmem>>, vector<16x32xf32>
    tpu.vector_store %arg4[%c0_89, %c0_90], %306 {strides = array<i32>} : memref<16x32xf32, #tpu.memory_space<vmem>>, vector<16x32xf32>,
    return
  }
}

</mosaic_0001>

<bundles_post_ra>
// kernel: tpu_custom_call.1
= control target key start
LH: loop header
LB: loop body
LE: loop exit
PB: predicated region body
PF: predicated region fallthrough
CT: control target
= control target key end

     0   :  { %9 = vsyncpa [#allocation3], 0  ;;  %s4033_s0 = inlined_call_operand.hbm [shape: f32[32,32], index: 0, kind: input, shape index: {}]   ;;  %s4034_s1 = inlined_call_operand.hbm [shape: f32[2,8,16], index: 1, kind: input, shape index: {}]   ;;  %s4035_s2 = inlined_call_operand.hbm [shape: bf16[32,384], index: 2, kind: input, shape index: {}]   ;;  %s4036_s3 = inlined_call_operand.hbm [shape: f32[8,128], index: 3, kind: input, shape index: {}]   ;;  %s4037_s4 = inlined_call_operand.hbm [shape: f32[16,32], index: 4, kind: output, shape index: {}]  }
   0x1   :  { %10 = vsyncpa [#allocation6], 0 }
   0x2   :  { %11 = vsyncpa [#allocation9], 0 }
   0x3   :  { %12 = vsyncpa [#allocation4], 0  ;;  %s3458_s15 = smov [#allocation5]   ;;  %s3459_s17 = smov [#allocation2]  }
   0x4   :  { %s30_s16 = sshll.u32 %s3458_s15, 4  ;;  %s18_s18 = sshll.u32 %s3459_s17, 4  ;;  %s31_s16 = int_to_ptr.vmem [resolvable:$true] %s30_s16  ;;  %s19_s18 = int_to_ptr.vmem [resolvable:$true] %s18_s18 }
   0x5   :  { %s3358_s19 = scalar_lea.vmem %s31_s16, 256  ;;  %p3363_p1 = scmp.lt.s32.totalorder %s31_s16, %s31_s16 }
   0x6   :  { %p3359_p0 = scmp.ne.s32.totalorder %s31_s16, %s3358_s19  ;;  %p3364_p2 = scmp.lt.s32.totalorder %s3358_s19, %s3358_s19 }
   0x8   :  { %p3365_p3 = por %p3364_p2, %p3363_p1 }
   0xa   :  { %p3366_p4 = pnand %p3365_p3, %p3359_p0 }
   0xc   :  { %3369 = shalt.err (!%p3366_p4)
}
   0xd   :  { %s3460_s20 = smov 128   ;;  %s3461_s21 = smov 8  }
   0xe   :  { %36 = dma.hbm_to_vmem [thread:$0]  %s4034_s1, 256, %s31_s16, [#allocation6], %s3460_s20, %s3460_s20, %s3461_s21  }
   0xf   :  { %s3378_s24 = scalar_lea.vmem %s19_s18, 512  ;;  %p3383_p6 = scmp.lt.s32.totalorder %s19_s18, %s19_s18 }
  0x10   :  { %p3379_p5 = scmp.ne.s32.totalorder %s19_s18, %s3378_s24  ;;  %p3384_p7 = scmp.lt.s32.totalorder %s3378_s24, %s3378_s24 }
  0x12   :  { %p3385_p8 = por %p3384_p7, %p3383_p6 }
  0x14   :  { %p3386_p9 = pnand %p3385_p8, %p3379_p5 }
  0x16   :  { %3389 = shalt.err (!%p3386_p9)
}
  0x17   :  { %24 = dma.hbm_to_vmem [thread:$0]  %s4033_s0, 512, %s19_s18, [#allocation3], %s3460_s20, %s3460_s20, %s3461_s21  }
  0x18   :  { %s3462_s27 = smov [#allocation7]  }
  0x19   :  { %s42_s28 = sshll.u32 %s3462_s27, 4  ;;  %s43_s28 = int_to_ptr.vmem [resolvable:$true] %s42_s28 }
  0x1a   :  { %s3398_s29 = scalar_lea.vmem %s43_s28, 768  ;;  %p3403_p11 = scmp.lt.s32.totalorder %s43_s28, %s43_s28 }
  0x1b   :  { %p3399_p10 = scmp.ne.s32.totalorder %s43_s28, %s3398_s29  ;;  %p3404_p12 = scmp.lt.s32.totalorder %s3398_s29, %s3398_s29 }
  0x1d   :  { %p3405_p13 = por %p3404_p12, %p3403_p11 }
  0x1f   :  { %p3406_p0 = pnand %p3405_p13, %p3399_p10 }
  0x21   :  { %3409 = shalt.err (!%p3406_p0)
}
  0x22   :  { %s3463_s1 = smov 192   ;;  %s3464_s30 = smov 12  }
  0x23   :  { %48 = dma.hbm_to_vmem [thread:$0]  %s4035_s2, 768, %s43_s28, [#allocation6], %s3463_s1, %s3463_s1, %s3464_s30  }
  0x24   :  { %s3465_s7 = smov [#allocation8]  }
  0x25   :  { %s55_s8 = sshll.u32 %s3465_s7, 4  ;;  %s56_s8 = int_to_ptr.vmem [resolvable:$true] %s55_s8 }
  0x26   :  { %s3418_s0 = scalar_lea.vmem %s56_s8, 128  ;;  %p3423_p2 = scmp.lt.s32.totalorder %s56_s8, %s56_s8 }
  0x27   :  { %p3419_p1 = scmp.ne.s32.totalorder %s56_s8, %s3418_s0  ;;  %p3424_p3 = scmp.lt.s32.totalorder %s3418_s0, %s3418_s0 }
  0x29   :  { %p3425_p4 = por %p3424_p3, %p3423_p2 }
  0x2b   :  { %p3426_p5 = pnand %p3425_p4, %p3419_p1 }
  0x2d   :  { %3429 = shalt.err (!%p3426_p5)
}
  0x2e   :  { %58 = dma.hbm_to_vmem [thread:$0]  %s4036_s3, 128, %s56_s8, [#allocation9]  }
  0x2f   :  { %3450 = dma.done.wait [#allocation3], 512  }
  0x30   :  { %3451 = vsyncadd [#allocation3], 4294966784 }
  0x31   :  { %3452 = dma.done.wait [#allocation6], 1024  }
  0x32   :  { %3453 = vsyncadd [#allocation6], 4294966272 }
  0x33   :  { %3454 = dma.done.wait [#allocation9], 128  }
  0x34   :  { %3455 = vsyncadd [#allocation9], 4294967168  ;;  %vm86_vm0 = vcmask 261120   ;;  %v3524_v0 = vld [vmem:[#allocation2] sm:$0xff]  ;;  %v3526_v1 = vld [vmem:[#allocation2 + $0x8] sm:$0xff]  ;;  %v3466_v15 = vmov 0.0  }
  0x35   :  { %v87_v2 = vsel %vm86_vm0, %v3524_v0, 0.0  ;;  %v90_v3 = vsel %vm86_vm0, %v3526_v1, 0.0  ;;  %v3250_v14 = vld [vmem:[#allocation7 + $0x18] ss:$12 sps:$4 sm:$0xff]   ;;  %2947 = vmatprep.subr.bf16.mxu1 %v3466_v15  ;;  %vm3467_vm1 = vmmov 0   ;;  %2961 = vmatprep.subr.bf16.mxu0 %v3466_v15  ;;  %s3468_s2 = smov 96  }
  0x36   :  { %88 = vadd.xlane.f32.xlu0 %v87_v2  ;;  %2951 = vmatprep.mubr.msk.bf16.mxu1 %vm3467_vm1, %v3466_v15  ;;  %v3251_v16 = vld [vmem:[#allocation7] ss:$12 sps:$4 sm:$0xff]   ;;  %v2776_v38 = vld [vmem:[#allocation8] ss:$0 sm:$0xff]  ;;  %vm203_vm6 = vcmask 64512   ;;  %v77_v52 = vld [vmem:[#allocation5 + $0x8] sm:$0xff] }
  0x37   :  { %2948 = vmatpush3.bf16.msra.mxu1 %v3250_v14  ;;  %2963 = vmatprep.mubr.msk.bf16.mxu0 %vm3467_vm1, %v3466_v15  ;;  %v76_v51 = vld [vmem:[#allocation5] sm:$0xff]  ;;  %vm79_vm8 = vcmp.eq.f32.partialorder %v77_v52, 0.0  ;;  %s3469_s3 = smov 64   ;;  %s3470_s11 = smov 88   ;;  %vm327_vm9 = vcmask 1043456   ;;  %vm2702_vm14 = vcmask 523264  }
  0x38   :  { %2949 = vmatprep.subr.bf16.mxu1 %v3466_v15  ;;  %vm78_vm7 = vcmp.eq.f32.partialorder %v76_v51, 0.0  ;;  %v3572_v57 = vsel %vm79_vm8, -1e+09, %v3466_v15  ;;  %s3471_s12 = smov 120   ;;  %s3472_s13 = smov 56  }
  0x39   :  { %v3568_v53 = vsel %vm78_vm7, -1e+09, %v3466_v15  ;;  %s3473_s14 = smov 80   ;;  %s3474_s15 = smov 112  }
  0x3a   :  { %91 = vadd.xlane.f32.xlu0 %v90_v3  ;;  %s3475_s16 = smov 48   ;;  %s3476_s17 = smov 72  }
  0x3b   :  { %2950 = vmatpush3.bf16.msra.mxu1 %v3251_v16  ;;  %s3477_s18 = smov 104   ;;  %s3478_s19 = smov 40  }
  0x3c   :  { %2955 = vmatprep.subr.bf16.mxu1 %v3466_v15  ;;  %s3479_s22 = smov 32   ;;  %s3480_s23 = smov [#allocation10]  }
  0x3d   :  { %s2762_s24 = sshll.u32 %s3480_s23, 4  ;;  %s2763_s24 = int_to_ptr.vmem [resolvable:$true] %s2762_s24 }
  0x3e   :  { %s3430_s25 = scalar_lea.vmem %s2763_s24, 256  ;;  %p3435_p7 = scmp.lt.s32.totalorder %s2763_s24, %s2763_s24 }
  0x3f   :  { %p3431_p6 = scmp.ne.s32.totalorder %s2763_s24, %s3430_s25  ;;  %p3436_p8 = scmp.lt.s32.totalorder %s3430_s25, %s3430_s25 }
  0x41   :  { %p3437_p9 = por %p3436_p8, %p3435_p7 }
  0x43   :  { %p3438_p10 = pnand %p3437_p9, %p3431_p6 }
  0xbf   :  { %v89_v4 = vpop.xlane.xlu0 %88 }
  0xc0   :  { %v94_v5 = vmul.f32 0.03125, %v89_v4 }
  0xc2   :  { %v96_v6 = vsub.f32 %v3524_v0, %v94_v5 }
  0xc3   :  { %v92_v7 = vpop.xlane.xlu0 %91 }
  0xc4   :  { %v95_v8 = vmul.f32 0.03125, %v92_v7  ;;  %v98_v9 = vmul.f32 %v96_v6, %v96_v6 }
  0xc6   :  { %v97_v10 = vsub.f32 %v3526_v1, %v95_v8  ;;  %v100_v11 = vsel %vm86_vm0, %v98_v9, 0.0 }
  0xc7   :  { %101 = vadd.xlane.f32.xlu1 %v100_v11 }
  0xc8   :  { %v99_v12 = vmul.f32 %v97_v10, %v97_v10 }
  0xca   :  { %v103_v13 = vsel %vm86_vm0, %v99_v12, 0.0 }
  0xcb   :  { %104 = vadd.xlane.f32.xlu1 %v103_v13 }
 0x150   :  { %v102_v17 = vpop.xlane.xlu1 %101 }
 0x151   :  { %v106_v18 = vmul.f32 0.032258064, %v102_v17 }
 0x153   :  { %3262 = vrsqrt.f32 %v106_v18  ;;  %vm110_vm2 = vcmp.eq.f32.partialorder %v106_v18, inf  ;;  %v113_v23 = vand.u32 2147483648, %v106_v18  ;;  %vm112_vm3 = vcmp.eq.f32.partialorder %v106_v18, 0.0 }
 0x154   :  { %v105_v19 = vpop.xlane.xlu1 %104 }
 0x155   :  { %v107_v20 = vmul.f32 0.032258064, %v105_v19 }
 0x157   :  { %3264 = vrsqrt.f32 %v107_v20  ;;  %vm117_vm4 = vcmp.eq.f32.partialorder %v107_v20, inf  ;;  %v120_v29 = vand.u32 2147483648, %v107_v20  ;;  %vm119_vm5 = vcmp.eq.f32.partialorder %v107_v20, 0.0 }
 0x160   :  { %v3263_v21 = vpop.eup %3262 }
 0x161   :  { %v109_v22 = vmul.f32 %v3263_v21, %v106_v18 }
 0x163   :  { %v111_v24 = vsel %vm110_vm2, %v106_v18, %v109_v22 }
 0x164   :  { %v3265_v25 = vpop.eup %3264  ;;  %v114_v26 = vsel %vm112_vm3, %v113_v23, %v111_v24 }
 0x165   :  { %v122_v27 = vadd.f32 1e-06, %v114_v26  ;;  %v116_v28 = vmul.f32 %v3265_v25, %v107_v20 }
 0x167   :  { %v118_v30 = vsel %vm117_vm4, %v107_v20, %v116_v28  ;;  %3266 = vrcp.f32 %v122_v27 }
 0x168   :  { %v121_v31 = vsel %vm119_vm5, %v120_v29, %v118_v30 }
 0x169   :  { %v123_v32 = vadd.f32 1e-06, %v121_v31 }
 0x16b   :  { %3268 = vrcp.f32 %v123_v32 }
 0x174   :  { %v3267_v33 = vpop.eup %3266 }
 0x175   :  { %v125_v35 = vmul.f32 %v3267_v33, %v96_v6 }
 0x178   :  { %v3269_v34 = vpop.eup %3268 }
 0x179   :  { %v127_v36 = vmul.f32 %v3269_v34, %v97_v10 }
 0x17b   :  { %v128_v37 = vpack.c.bf16 %v127_v36, %v125_v35 }
 0x17d   :  { %2952 = vmatmul.mubr.msk.bf16.vlgmr.msra.gmra.mxu1 %vm86_vm0, %v128_v37 }
 0x17e   :  { %2957 = vmatprep.mubr.msk.bf16.mxu1 %vm3467_vm1, %v3466_v15 }
 0x23d   :  { %v187_v39 = vpop.f32.mrf.mxu1 }
 0x23e   :  { %v188_v40 = vadd.f32 %v2776_v38, %v187_v39 }
 0x23f   :  { %v2953_v41 = vpop.f32.mrf.mxu1 }
 0x240   :  { %v3547_v42 = vpack.c.bf16 %v188_v40, %v188_v40 }
 0x241   :  { %v190_v43 = vpop.f32.mrf.mxu1 }
 0x242   :  { %v191_v44 = vadd.f32 %v2776_v38, %v190_v43  ;;  %201 = vrot.lane.b32.xlu0 %v3547_v42, %s3468_s2 }
 0x243   :  { %v2954_v45 = vpop.f32.mrf.mxu1 }
 0x244   :  { %v3551_v46 = vpack.c.bf16 %v191_v44, %v191_v44 }
 0x246   :  { %250 = vrot.lane.b32.xlu1 %v3551_v46, %s3468_s2 }
 0x2b4   :  { %v202_v47 = vpop.permute.xlu0 %201 }
 0x2b5   :  { %v208_v48 = vsel %vm203_vm6, %v202_v47, 0 }
 0x2b6   :  { %2956 = vmatpush3.bf16.xpose.msra.mxu1 %v208_v48 }
 0x2b7   :  { %2967 = vmatprep.subr.bf16.mxu1 %v3466_v15 }
 0x2b8   :  { %v251_v49 = vpop.permute.xlu1 %250 }
 0x2b9   :  { %v256_v50 = vsel %vm203_vm6, %v251_v49, 0 }
 0x2ba   :  { %2962 = vmatpush3.bf16.xpose.msra.mxu0 %v256_v50 }
 0x2bb   :  { %2973 = vmatprep.subr.bf16.mxu0 %v3466_v15 }
 0x2bd   :  { %2958 = vmatmul.mubr.msk.bf16.vlgmr.msra.gmra.mxu1 %vm203_vm6, %v3547_v42 }
 0x2be   :  { %2969 = vmatprep.mubr.msk.bf16.mxu1 %vm3467_vm1, %v3466_v15 }
 0x2c1   :  { %2964 = vmatmul.mubr.msk.bf16.vlgmr.msra.gmra.mxu0 %vm203_vm6, %v3551_v46 }
 0x2c2   :  { %2975 = vmatprep.mubr.msk.bf16.mxu0 %vm3467_vm1, %v3466_v15 }
 0x37d   :  { %v244_v54 = vpop.f32.mrf.mxu1 }
 0x37e   :  { %v245_v55 = vadd.f32 %v244_v54, %v3568_v53 }
 0x37f   :  { %v2959_v56 = vpop.f32.mrf.mxu1 }
 0x380   :  { %v298_v58 = vsel %vm203_vm6, %v245_v55, -inf }
 0x381   :  { %v292_v59 = vpop.f32.mrf.mxu0  ;;  %299 = vmax.xlane.f32.xlu1 %v298_v58  ;;  %v247_v60 = vpop.f32.mrf.mxu1 }
 0x382   :  { %v293_v61 = vadd.f32 %v292_v59, %v3572_v57  ;;  %v3622_v59 = vld [vmem:[#allocation7 + $0x10] ss:$0 sps:$4 sm:$0xff]   ;;  %v3626_v60 = vld [vmem:[#allocation7 + $0x4] ss:$0 sps:$4 sm:$0xff]  }
 0x383   :  { %v2960_v62 = vpop.f32.mrf.mxu1  ;;  %v2965_v63 = vpop.f32.mrf.mxu0 }
 0x384   :  { %v301_v2 = vsel %vm203_vm6, %v293_v61, -inf }
 0x385   :  { %302 = vmax.xlane.f32.xlu0 %v301_v2  ;;  %v295_v3 = vpop.f32.mrf.mxu0 }
 0x387   :  { %v2966_v4 = vpop.f32.mrf.mxu0 }
 0x392   :  { %371 = vrot.lane.b32.xlu1 %v3551_v46, %s3469_s3 }
 0x396   :  { %422 = vrot.lane.b32.xlu1 %v3547_v42, %s3470_s11 }
 0x40a   :  { %v300_v5 = vpop.xlane.xlu1 %299 }
 0x40b   :  { %v304_v6 = vsub.f32 %v245_v55, %v300_v5 }
 0x40d   :  { %v306_v7 = vmul.f32 1.442695, %v304_v6 }
 0x40e   :  { %v303_v8 = vpop.xlane.xlu0 %302  ;;  %v372_v9 = vpop.permute.xlu1 %371 }
 0x40f   :  { %3270 = vpow2.f32 %v306_v7  ;;  %v305_v10 = vsub.f32 %v293_v61, %v303_v8  ;;  %v377_v11 = vsel %vm327_vm9, %v372_v9, 0 }
 0x410   :  { %2974 = vmatpush3.bf16.msra.mxu0 %v377_v11 }
 0x411   :  { %v308_v12 = vmul.f32 1.442695, %v305_v10  ;;  %2985 = vmatprep.subr.bf16.mxu0 %v3466_v15 }
 0x412   :  { %v423_v18 = vpop.permute.xlu1 %422 }
 0x413   :  { %3272 = vpow2.f32 %v308_v12  ;;  %v428_v27 = vsel %vm203_vm6, %v423_v18, 0 }
 0x41c   :  { %v3271_v13 = vpop.eup %3270 }
 0x41d   :  { %v310_v14 = vsel %vm203_vm6, %v3271_v13, 0.0 }
 0x41e   :  { %311 = vadd.xlane.f32.xlu0 %v310_v14 }
 0x420   :  { %v3273_v16 = vpop.eup %3272 }
 0x421   :  { %v313_v17 = vsel %vm203_vm6, %v3273_v16, 0.0 }
 0x422   :  { %314 = vadd.xlane.f32.xlu1 %v313_v17 }
 0x433   :  { %472 = vrot.lane.b32.xlu1 %v3551_v46, %s3470_s11 }
 0x434   :  { %322 = vrot.lane.b32.xlu0 %v3547_v42, %s3469_s3 }
 0x437   :  { %470 = vrot.lane.b32.xlu1 %v3551_v46, %s3471_s12 }
 0x438   :  { %420 = vrot.lane.b32.xlu0 %v3547_v42, %s3471_s12 }
 0x4a7   :  { %v312_v19 = vpop.xlane.xlu0 %311 }
 0x4a8   :  { %3274 = vrcp.f32 %v312_v19 }
 0x4ab   :  { %v323_v20 = vpop.permute.xlu0 %322  ;;  %v315_v21 = vpop.xlane.xlu1 %314 }
 0x4ac   :  { %v329_v22 = vsel %vm327_vm9, %v323_v20, 0  ;;  %3276 = vrcp.f32 %v315_v21 }
 0x4ad   :  { %2968 = vmatpush3.bf16.msra.mxu1 %v329_v22 }
 0x4ae   :  { %2979 = vmatprep.subr.bf16.mxu1 %v3466_v15 }
 0x4af   :  { %v473_v29 = vpop.permute.xlu1 %472  ;;  %v421_v32 = vpop.permute.xlu0 %420 }
 0x4b0   :  { %v478_v31 = vsel %vm203_vm6, %v473_v29, 0 }
 0x4b3   :  { %v471_v33 = vpop.permute.xlu1 %470 }
 0x4b5   :  { %v3275_v23 = vpop.eup %3274 }
 0x4b6   :  { %v318_v24 = vmul.f32 %v3275_v23, %v3271_v13 }
 0x4b8   :  { %v320_v25 = vpack.c.bf16 %v318_v24, %v318_v24 }
 0x4b9   :  { %v3277_v26 = vpop.eup %3276 }
 0x4ba   :  { %2970 = vmatmul.mubr.msk.bf16.vlgmr.msra.gmra.mxu1 %vm203_vm6, %v320_v25  ;;  %v319_v28 = vmul.f32 %v3277_v26, %v3273_v16 }
 0x4bb   :  { %2980 = vmatpush3.bf16.xpose.msra.mxu1 %v428_v27  ;;  %2981 = vmatprep.mubr.msk.bf16.mxu1 %vm3467_vm1, %v3466_v15 }
 0x4bc   :  { %v321_v30 = vpack.c.bf16 %v319_v28, %v319_v28  ;;  %2991 = vmatprep.subr.bf16.mxu1 %v3466_v15 }
 0x4be   :  { %2976 = vmatmul.mubr.msk.bf16.vlgmr.msra.gmra.mxu0 %vm203_vm6, %v321_v30 }
 0x4bf   :  { %2986 = vmatpush3.bf16.xpose.msra.mxu0 %v478_v31  ;;  %2987 = vmatprep.mubr.msk.bf16.mxu0 %vm3467_vm1, %v3466_v15 }
 0x4c0   :  { %2997 = vmatprep.subr.bf16.mxu0 %v3466_v15 }
 0x4c2   :  { %2982 = vmatmul.mubr.msk.bf16.vlgmr.msra.gmra.mxu1 %vm203_vm6, %v421_v32 }
 0x4c3   :  { %2993 = vmatprep.mubr.msk.bf16.mxu1 %vm3467_vm1, %v3466_v15 }
 0x4c6   :  { %2988 = vmatmul.mubr.msk.bf16.vlgmr.msra.gmra.mxu0 %vm203_vm6, %v471_v33 }
 0x4c7   :  { %2999 = vmatprep.mubr.msk.bf16.mxu0 %vm3467_vm1, %v3466_v15 }
 0x57a   :  { %v3611_v34 = vpop.f32.mrf.mxu1 }
 0x57c   :  { %v2971_v35 = vpop.f32.mrf.mxu1 }
 0x57e   :  { %v368_v36 = vpop.f32.mrf.mxu1  ;;  %v3613_v37 = vpop.f32.mrf.mxu0 }
 0x57f   :  { %v419_v38 = vpack.c.bf16 %v3613_v37, %v3611_v34 }
 0x580   :  { %v2972_v39 = vpop.f32.mrf.mxu1  ;;  %v2977_v40 = vpop.f32.mrf.mxu0 }
 0x582   :  { %v416_v41 = vpop.f32.mrf.mxu0  ;;  %v464_v43 = vpop.f32.mrf.mxu1 }
 0x583   :  { %v465_v44 = vadd.f32 %v464_v43, %v3568_v53 }
 0x584   :  { %v2978_v45 = vpop.f32.mrf.mxu0  ;;  %v2983_v47 = vpop.f32.mrf.mxu1 }
 0x585   :  { %v520_v48 = vsel %vm203_vm6, %v465_v44, -inf }
 0x586   :  { %v514_v49 = vpop.f32.mrf.mxu0  ;;  %521 = vmax.xlane.f32.xlu0 %v520_v48  ;;  %v467_v50 = vpop.f32.mrf.mxu1 }
 0x587   :  { %v515_v51 = vadd.f32 %v514_v49, %v3572_v57 }
 0x588   :  { %v2984_v52 = vpop.f32.mrf.mxu1  ;;  %v2989_v54 = vpop.f32.mrf.mxu0 }
 0x589   :  { %v523_v55 = vsel %vm203_vm6, %v515_v51, -inf  ;;  %v3682_v54 = vld [vmem:[#allocation7 + $0x1c] ss:$0 sps:$4 sm:$0xff]  }
 0x58a   :  { %524 = vmax.xlane.f32.xlu1 %v523_v55  ;;  %v517_v56 = vpop.f32.mrf.mxu0 }
 0x58c   :  { %v2990_v58 = vpop.f32.mrf.mxu0 }
 0x59b   :  { %592 = vrot.lane.b32.xlu1 %v3551_v46, %s3472_s13 }
 0x59f   :  { %644 = vrot.lane.b32.xlu1 %v3622_v59, %s3469_s3 }
 0x5a3   :  { %696 = vrot.lane.b32.xlu1 %v3626_v60, %s3469_s3 }
 0x5a7   :  { %797 = vrot.lane.b32.xlu1 %v3551_v46, %s3473_s14 }
 0x5ab   :  { %795 = vrot.lane.b32.xlu1 %v3551_v46, %s3474_s15 }
 0x60f   :  { %v522_v61 = vpop.xlane.xlu0 %521 }
 0x610   :  { %v526_v62 = vsub.f32 %v465_v44, %v522_v61 }
 0x612   :  { %v528_v63 = vmul.f32 1.442695, %v526_v62 }
 0x613   :  { %v525_v2 = vpop.xlane.xlu1 %524 }
 0x614   :  { %3278 = vpow2.f32 %v528_v63  ;;  %v527_v3 = vsub.f32 %v515_v51, %v525_v2 }
 0x616   :  { %v530_v4 = vmul.f32 1.442695, %v527_v3 }
 0x617   :  { %v593_v5 = vpop.permute.xlu1 %592 }
 0x618   :  { %3280 = vpow2.f32 %v530_v4  ;;  %v598_v6 = vsel %vm327_vm9, %v593_v5, 0 }
 0x619   :  { %2998 = vmatpush3.bf16.msra.mxu0 %v598_v6 }
 0x61a   :  { %3009 = vmatprep.subr.bf16.mxu0 %v3466_v15 }
 0x61b   :  { %v645_v17 = vpop.permute.xlu1 %644 }
 0x61c   :  { %v650_v19 = vsel %vm327_vm9, %v645_v17, 0 }
 0x61f   :  { %v697_v23 = vpop.permute.xlu1 %696 }
 0x620   :  { %v702_v24 = vsel %vm327_vm9, %v697_v23, 0 }
 0x621   :  { %v3279_v7 = vpop.eup %3278 }
 0x622   :  { %v532_v8 = vsel %vm203_vm6, %v3279_v7, 0.0 }
 0x623   :  { %533 = vadd.xlane.f32.xlu0 %v532_v8  ;;  %v798_v26 = vpop.permute.xlu1 %797 }
 0x624   :  { %v803_v27 = vsel %vm203_vm6, %v798_v26, 0 }
 0x625   :  { %v3281_v9 = vpop.eup %3280 }
 0x626   :  { %v535_v10 = vsel %vm203_vm6, %v3281_v9, 0.0 }
 0x627   :  { %536 = vadd.xlane.f32.xlu0 %v535_v10  ;;  %v796_v28 = vpop.permute.xlu1 %795 }
 0x63d   :  { %544 = vrot.lane.b32.xlu0 %v3547_v42, %s3472_s13 }
 0x641   :  { %747 = vrot.lane.b32.xlu0 %v3547_v42, %s3473_s14 }
 0x645   :  { %745 = vrot.lane.b32.xlu0 %v3547_v42, %s3474_s15 }
 0x6ac   :  { %v534_v11 = vpop.xlane.xlu0 %533 }
 0x6ad   :  { %3282 = vrcp.f32 %v534_v11 }
 0x6b0   :  { %v537_v12 = vpop.xlane.xlu0 %536 }
 0x6b1   :  { %3284 = vrcp.f32 %v537_v12 }
 0x6b4   :  { %v545_v13 = vpop.permute.xlu0 %544 }
 0x6b5   :  { %v550_v14 = vsel %vm327_vm9, %v545_v13, 0 }
 0x6b6   :  { %2992 = vmatpush3.bf16.msra.mxu1 %v550_v14 }
 0x6b7   :  { %3003 = vmatprep.subr.bf16.mxu1 %v3466_v15 }
 0x6b8   :  { %v748_v31 = vpop.permute.xlu0 %747 }
 0x6b9   :  { %v753_v37 = vsel %vm203_vm6, %v748_v31, 0 }
 0x6ba   :  { %v3283_v16 = vpop.eup %3282 }
 0x6bb   :  { %v540_v18 = vmul.f32 %v3283_v16, %v3279_v7 }
 0x6bc   :  { %v746_v41 = vpop.permute.xlu0 %745 }
 0x6bd   :  { %v542_v20 = vpack.c.bf16 %v540_v18, %v540_v18 }
 0x6be   :  { %v3285_v21 = vpop.eup %3284 }
 0x6bf   :  { %2994 = vmatmul.mubr.msk.bf16.vlgmr.msra.gmra.mxu1 %vm203_vm6, %v542_v20  ;;  %v541_v22 = vmul.f32 %v3285_v21, %v3281_v9 }
 0x6c0   :  { %3004 = vmatpush3.bf16.msra.mxu1 %v650_v19  ;;  %3005 = vmatprep.mubr.msk.bf16.mxu1 %vm3467_vm1, %v3466_v15 }
 0x6c1   :  { %v543_v25 = vpack.c.bf16 %v541_v22, %v541_v22  ;;  %3015 = vmatprep.subr.bf16.mxu1 %v3466_v15 }
 0x6c3   :  { %3000 = vmatmul.mubr.msk.bf16.vlgmr.msra.gmra.mxu0 %vm203_vm6, %v543_v25 }
 0x6c4   :  { %3010 = vmatpush3.bf16.msra.mxu0 %v702_v24  ;;  %3011 = vmatprep.mubr.msk.bf16.mxu0 %vm3467_vm1, %v3466_v15 }
 0x6c5   :  { %3021 = vmatprep.subr.bf16.mxu0 %v3466_v15 }
 0x6cb   :  { %3012 = vmatmul.mubr.msk.bf16.vlgmr.msra.gmra.mxu0 %vm203_vm6, %v419_v38 }
 0x6cc   :  { %3022 = vmatpush3.bf16.xpose.msra.mxu0 %v803_v27  ;;  %3023 = vmatprep.mubr.msk.bf16.mxu0 %vm3467_vm1, %v3466_v15 }
 0x6cd   :  { %3033 = vmatprep.subr.bf16.mxu0 %v3466_v15 }
 0x6d3   :  { %3024 = vmatmul.mubr.msk.bf16.vlgmr.msra.gmra.mxu0 %vm203_vm6, %v796_v28 }
 0x6d4   :  { %3035 = vmatprep.mubr.msk.bf16.mxu0 %vm3467_vm1, %v3466_v15 }
 0x77f   :  { %v586_v29 = vpop.f32.mrf.mxu1 }
 0x781   :  { %v2995_v30 = vpop.f32.mrf.mxu1 }
 0x783   :  { %v589_v32 = vpop.f32.mrf.mxu1  ;;  %v634_v33 = vpop.f32.mrf.mxu0 }
 0x784   :  { %v640_v34 = vpack.c.bf16 %v634_v33, %v586_v29 }
 0x785   :  { %v2996_v35 = vpop.f32.mrf.mxu1  ;;  %v3001_v36 = vpop.f32.mrf.mxu0 }
 0x786   :  { %3006 = vmatmul.mubr.msk.bf16.vlgmr.msra.gmra.mxu1 %vm203_vm6, %v640_v34 }
 0x787   :  { %3016 = vmatpush3.bf16.xpose.msra.mxu1 %v753_v37  ;;  %v637_v38 = vpop.f32.mrf.mxu0  ;;  %3017 = vmatprep.mubr.msk.bf16.mxu1 %vm3467_vm1, %v3466_v15 }
 0x788   :  { %3027 = vmatprep.subr.bf16.mxu1 %v3466_v15 }
 0x789   :  { %v3002_v39 = vpop.f32.mrf.mxu0 }
 0x78b   :  { %v3671_v40 = vpop.f32.mrf.mxu0 }
 0x78d   :  { %v3013_v43 = vpop.f32.mrf.mxu0 }
 0x78e   :  { %3018 = vmatmul.mubr.msk.bf16.vlgmr.msra.gmra.mxu1 %vm203_vm6, %v746_v41 }
 0x78f   :  { %v3674_v44 = vpop.f32.mrf.mxu0  ;;  %3029 = vmatprep.mubr.msk.bf16.mxu1 %vm3467_vm1, %v3466_v15 }
 0x791   :  { %v3014_v45 = vpop.f32.mrf.mxu0 }
 0x793   :  { %v839_v47 = vpop.f32.mrf.mxu0 }
 0x794   :  { %v840_v48 = vadd.f32 %v839_v47, %v3572_v57 }
 0x795   :  { %v3025_v49 = vpop.f32.mrf.mxu0 }
 0x796   :  { %v848_v50 = vsel %vm203_vm6, %v840_v48, -inf }
 0x797   :  { %849 = vmax.xlane.f32.xlu1 %v848_v50  ;;  %v842_v51 = vpop.f32.mrf.mxu0 }
 0x799   :  { %v3026_v52 = vpop.f32.mrf.mxu0 }
 0x7a8   :  { %917 = vrot.lane.b32.xlu1 %v3551_v46, %s3475_s16 }
 0x7ac   :  { %969 = vrot.lane.b32.xlu1 %v3682_v54, %s3469_s3 }
 0x7b0   :  { %1022 = vrot.lane.b32.xlu1 %v3547_v42, %s3476_s17 }
 0x7b4   :  { %1020 = vrot.lane.b32.xlu1 %v3547_v42, %s3477_s18 }
 0x820   :  { %v850_v55 = vpop.xlane.xlu1 %849 }
 0x821   :  { %v852_v61 = vsub.f32 %v840_v48, %v850_v55 }
 0x823   :  { %v855_v62 = vmul.f32 1.442695, %v852_v61 }
 0x824   :  { %v918_v56 = vpop.permute.xlu1 %917 }
 0x825   :  { %v923_v58 = vsel %vm327_vm9, %v918_v56, 0  ;;  %3286 = vpow2.f32 %v855_v62 }
 0x826   :  { %3034 = vmatpush3.bf16.msra.mxu0 %v923_v58 }
 0x827   :  { %3045 = vmatprep.subr.bf16.mxu0 %v3466_v15 }
 0x828   :  { %v970_v18 = vpop.permute.xlu1 %969 }
 0x829   :  { %v975_v32 = vsel %vm327_vm9, %v970_v18, 0 }
 0x82c   :  { %v1023_v23 = vpop.permute.xlu1 %1022 }
 0x82d   :  { %v1028_v25 = vsel %vm203_vm6, %v1023_v23, 0 }
 0x830   :  { %v1021_v26 = vpop.permute.xlu1 %1020 }
 0x832   :  { %v3287_v9 = vpop.eup %3286 }
 0x833   :  { %v860_v12 = vsel %vm203_vm6, %v3287_v9, 0.0 }
 0x846   :  { %v3692_v63 = vpop.f32.mrf.mxu1 }
 0x848   :  { %v3007_v2 = vpop.f32.mrf.mxu1 }
 0x84a   :  { %v3694_v3 = vpop.f32.mrf.mxu1 }
 0x84c   :  { %v3008_v4 = vpop.f32.mrf.mxu1 }
 0x84e   :  { %v789_v5 = vpop.f32.mrf.mxu1 }
 0x84f   :  { %v790_v6 = vadd.f32 %v789_v5, %v3568_v53  ;;  %v739_v5 = vadd.f32 %v3671_v40, %v3692_v63 }
 0x850   :  { %v3019_v7 = vpop.f32.mrf.mxu1 }
 0x851   :  { %v845_v8 = vsel %vm203_vm6, %v790_v6, -inf }
 0x852   :  { %846 = vmax.xlane.f32.xlu0 %v845_v8  ;;  %v792_v10 = vpop.f32.mrf.mxu1 }
 0x854   :  { %v3020_v11 = vpop.f32.mrf.mxu1 }
 0x856   :  { %861 = vadd.xlane.f32.xlu0 %v860_v12 }
 0x8db   :  { %v847_v13 = vpop.xlane.xlu0 %846 }
 0x8dc   :  { %v851_v14 = vsub.f32 %v790_v6, %v847_v13 }
 0x8de   :  { %v853_v16 = vmul.f32 1.442695, %v851_v14 }
 0x8df   :  { %v862_v17 = vpop.xlane.xlu0 %861 }
 0x8e0   :  { %3288 = vpow2.f32 %v853_v16 }
 0x8e1   :  { %3290 = vrcp.f32 %v862_v17 }
 0x8ed   :  { %v3289_v19 = vpop.eup %3288 }
 0x8ee   :  { %v3291_v20 = vpop.eup %3290  ;;  %v857_v21 = vsel %vm203_vm6, %v3289_v19, 0.0 }
 0x8ef   :  { %858 = vadd.xlane.f32.xlu0 %v857_v21  ;;  %v866_v22 = vmul.f32 %v3291_v20, %v3287_v9  ;;  %v742_v9 = vadd.f32 %v3674_v44, %v3694_v3 }
 0x8f1   :  { %v868_v24 = vpack.c.bf16 %v866_v22, %v866_v22 }
 0x8f3   :  { %3036 = vmatmul.mubr.msk.bf16.vlgmr.msra.gmra.mxu0 %vm203_vm6, %v868_v24 }
 0x8f4   :  { %3046 = vmatpush3.bf16.xpose.msra.mxu0 %v1028_v25  ;;  %3047 = vmatprep.mubr.msk.bf16.mxu0 %vm3467_vm1, %v3466_v15 }
 0x8f5   :  { %3057 = vmatprep.subr.bf16.mxu0 %v3466_v15 }
 0x8fb   :  { %3048 = vmatmul.mubr.msk.bf16.vlgmr.msra.gmra.mxu0 %vm203_vm6, %v1021_v26 }
 0x8fc   :  { %3059 = vmatprep.mubr.msk.bf16.mxu0 %vm3467_vm1, %v3466_v15 }
 0x905   :  { %869 = vrot.lane.b32.xlu0 %v3547_v42, %s3475_s16 }
 0x909   :  { %1072 = vrot.lane.b32.xlu0 %v3551_v46, %s3476_s17 }
 0x90d   :  { %1070 = vrot.lane.b32.xlu0 %v3551_v46, %s3477_s18 }
 0x978   :  { %v859_v27 = vpop.xlane.xlu0 %858 }
 0x979   :  { %3292 = vrcp.f32 %v859_v27  ;;  %v3748_v27 = vld [vmem:[#allocation7 + $0x28] ss:$0 sps:$4 sm:$0xff]  }
 0x97c   :  { %v870_v28 = vpop.permute.xlu0 %869 }
 0x97d   :  { %v875_v29 = vsel %vm327_vm9, %v870_v28, 0 }
 0x97e   :  { %3028 = vmatpush3.bf16.msra.mxu1 %v875_v29 }
 0x97f   :  { %3039 = vmatprep.subr.bf16.mxu1 %v3466_v15 }
 0x980   :  { %v1073_v49 = vpop.permute.xlu0 %1072 }
 0x981   :  { %v1078_v58 = vsel %vm203_vm6, %v1073_v49, 0 }
 0x984   :  { %v1071_v62 = vpop.permute.xlu0 %1070 }
 0x986   :  { %v3293_v30 = vpop.eup %3292 }
 0x987   :  { %v865_v31 = vmul.f32 %v3293_v30, %v3289_v19 }
 0x989   :  { %v867_v33 = vpack.c.bf16 %v865_v31, %v865_v31 }
 0x98b   :  { %3030 = vmatmul.mubr.msk.bf16.vlgmr.msra.gmra.mxu1 %vm203_vm6, %v867_v33 }
 0x98c   :  { %3040 = vmatpush3.bf16.msra.mxu1 %v975_v32  ;;  %3041 = vmatprep.mubr.msk.bf16.mxu1 %vm3467_vm1, %v3466_v15 }
 0x98d   :  { %3051 = vmatprep.subr.bf16.mxu1 %v3466_v15 }
 0x9b3   :  { %v959_v34 = vpop.f32.mrf.mxu0 }
 0x9b5   :  { %v3037_v35 = vpop.f32.mrf.mxu0 }
 0x9b7   :  { %v962_v36 = vpop.f32.mrf.mxu0 }
 0x9b9   :  { %v3038_v37 = vpop.f32.mrf.mxu0 }
 0x9bb   :  { %v1064_v38 = vpop.f32.mrf.mxu0 }
 0x9bc   :  { %v1065_v39 = vadd.f32 %v1064_v38, %v3568_v53 }
 0x9bd   :  { %v3049_v41 = vpop.f32.mrf.mxu0 }
 0x9be   :  { %v1120_v43 = vsel %vm203_vm6, %v1065_v39, -inf }
 0x9bf   :  { %1121 = vmax.xlane.f32.xlu1 %v1120_v43  ;;  %v1067_v45 = vpop.f32.mrf.mxu0 }
 0x9c1   :  { %v3050_v47 = vpop.f32.mrf.mxu0 }
 0x9d0   :  { %1144 = vrot.lane.b32.xlu1 %v3547_v42, %s3478_s19 }
 0x9d4   :  { %1244 = vrot.lane.b32.xlu1 %v3748_v27, %s3469_s3 }
 0xa48   :  { %v1122_v48 = vpop.xlane.xlu1 %1121 }
 0xa49   :  { %v1126_v2 = vsub.f32 %v1065_v39, %v1122_v48  ;;  %v2806_v48 = vld [vmem:[#allocation8 + $0x3] ss:$0 sm:$0xff] }
 0xa4b   :  { %v911_v50 = vpop.f32.mrf.mxu1  ;;  %v1128_v4 = vmul.f32 1.442695, %v1126_v2 }
 0xa4c   :  { %v1145_v51 = vpop.permute.xlu1 %1144  ;;  %v965_v52 = vpack.c.bf16 %v959_v34, %v911_v50 }
 0xa4d   :  { %v1150_v55 = vsel %vm327_vm9, %v1145_v51, 0  ;;  %v3031_v56 = vpop.f32.mrf.mxu1  ;;  %3294 = vpow2.f32 %v1128_v4 }
 0xa4e   :  { %3058 = vmatpush3.bf16.msra.mxu0 %v1150_v55  ;;  %3042 = vmatmul.mubr.msk.bf16.vlgmr.msra.gmra.mxu1 %vm203_vm6, %v965_v52 }
 0xa4f   :  { %3052 = vmatpush3.bf16.xpose.msra.mxu1 %v1078_v58  ;;  %v914_v61 = vpop.f32.mrf.mxu1  ;;  %3053 = vmatprep.mubr.msk.bf16.mxu1 %vm3467_vm1, %v3466_v15 }
 0xa50   :  { %3063 = vmatprep.subr.bf16.mxu1 %v3466_v15  ;;  %3069 = vmatprep.subr.bf16.mxu0 %v3466_v15 }
 0xa51   :  { %v3032_v42 = vpop.f32.mrf.mxu1 }
 0xa56   :  { %3054 = vmatmul.mubr.msk.bf16.vlgmr.msra.gmra.mxu1 %vm203_vm6, %v1071_v62 }
 0xa57   :  { %3065 = vmatprep.mubr.msk.bf16.mxu1 %vm3467_vm1, %v3466_v15 }
 0xa5a   :  { %v3295_v18 = vpop.eup %3294 }
 0xa5b   :  { %v1132_v63 = vsel %vm203_vm6, %v3295_v18, 0.0 }
 0xb0e   :  { %v1011_v6 = vpop.f32.mrf.mxu1 }
 0xb0f   :  { %v1018_v7 = vadd.f32 %v1011_v6, %v739_v5 }
 0xb10   :  { %v3043_v8 = vpop.f32.mrf.mxu1 }
 0xb12   :  { %v1014_v10 = vpop.f32.mrf.mxu1 }
 0xb13   :  { %v1019_v11 = vadd.f32 %v1014_v10, %v742_v9 }
 0xb14   :  { %v3044_v12 = vpop.f32.mrf.mxu1 }
 0xb16   :  { %v1114_v13 = vpop.f32.mrf.mxu1 }
 0xb17   :  { %v1115_v14 = vadd.f32 %v1114_v13, %v3572_v57  ;;  %v3257_v13 = vld [vmem:[#allocation7] ss:$12 sps:$4 sm:$0xff]  }
 0xb18   :  { %v3055_v16 = vpop.f32.mrf.mxu1 }
 0xb19   :  { %v1123_v17 = vsel %vm203_vm6, %v1115_v14, -inf  ;;  %v3258_v16 = vld [vmem:[#allocation7 + $0x1c] ss:$12 sps:$4 sm:$0xff]  }
 0xb1a   :  { %1124 = vmax.xlane.f32.xlu0 %v1123_v17  ;;  %v1117_v19 = vpop.f32.mrf.mxu1  ;;  %v3259_v17 = vld [vmem:[#allocation7 + $0x4] ss:$12 sps:$4 sm:$0xff]  }
 0xb1b   :  { %v75_v19 = vld [vmem:[#allocation2 + $0x18] sm:$0xff] }
 0xb1c   :  { %v3056_v40 = vpop.f32.mrf.mxu1 }
 0xb1e   :  { %1133 = vadd.xlane.f32.xlu0 %v1132_v63 }
 0xba3   :  { %v1125_v20 = vpop.xlane.xlu0 %1124 }
 0xba4   :  { %v1127_v21 = vsub.f32 %v1115_v14, %v1125_v20  ;;  %v3256_v14 = vld [vmem:[#allocation7 + $0x18] ss:$12 sps:$4 sm:$0xff]  }
 0xba6   :  { %v1130_v22 = vmul.f32 1.442695, %v1127_v21 }
 0xba7   :  { %v1134_v44 = vpop.xlane.xlu0 %1133 }
 0xba8   :  { %3296 = vpow2.f32 %v1130_v22 }
 0xba9   :  { %3298 = vrcp.f32 %v1134_v44 }
 0xbb5   :  { %v3297_v3 = vpop.eup %3296 }
 0xbb6   :  { %v3299_v23 = vpop.eup %3298  ;;  %v1135_v24 = vsel %vm203_vm6, %v3297_v3, 0.0 }
 0xbb7   :  { %1136 = vadd.xlane.f32.xlu0 %v1135_v24  ;;  %v1140_v25 = vmul.f32 %v3299_v23, %v3295_v18  ;;  %v74_v18 = vld [vmem:[#allocation2 + $0x10] sm:$0xff] }
 0xbb8   :  { %v1413_v40 = vpack.c.bf16 %v75_v19, %v74_v18 }
 0xbb9   :  { %v1142_v26 = vpack.c.bf16 %v1140_v25, %v1140_v25 }
 0xbbb   :  { %3060 = vmatmul.mubr.msk.bf16.vlgmr.msra.gmra.mxu0 %vm203_vm6, %v1142_v26 }
 0xbbc   :  { %3071 = vmatprep.mubr.msk.bf16.mxu0 %vm3467_vm1, %v3466_v15 }
 0xbcd   :  { %1192 = vrot.lane.b32.xlu0 %v3551_v46, %s3478_s19  ;;  %v1245_v46 = vpop.permute.xlu1 %1244 }
 0xbce   :  { %v1250_v34 = vsel %vm327_vm9, %v1245_v46, 0 }
 0xbcf   :  { %3070 = vmatpush3.bf16.msra.mxu0 %v1250_v34 }
 0xbd0   :  { %3083 = vmatprep.subr.bf16.mxu0 %v3466_v15 }
 0xc40   :  { %v1137_v28 = vpop.xlane.xlu0 %1136 }
 0xc41   :  { %3300 = vrcp.f32 %v1137_v28 }
 0xc44   :  { %v1193_v29 = vpop.permute.xlu0 %1192 }
 0xc45   :  { %v1198_v30 = vsel %vm327_vm9, %v1193_v29, 0 }
 0xc46   :  { %3064 = vmatpush3.bf16.msra.mxu1 %v1198_v30 }
 0xc47   :  { %3075 = vmatprep.subr.bf16.mxu1 %v3466_v15 }
 0xc4e   :  { %v3301_v31 = vpop.eup %3300 }
 0xc4f   :  { %v1141_v32 = vmul.f32 %v3301_v31, %v3297_v3 }
 0xc51   :  { %v1143_v33 = vpack.c.bf16 %v1141_v32, %v1141_v32 }
 0xc53   :  { %3066 = vmatmul.mubr.msk.bf16.vlgmr.msra.gmra.mxu1 %vm203_vm6, %v1143_v33 }
 0xc54   :  { %3079 = vmatprep.mubr.msk.bf16.mxu1 %vm3467_vm1, %v3466_v15 }
 0xc7b   :  { %v1186_v35 = vpop.f32.mrf.mxu0 }
 0xc7d   :  { %v3061_v36 = vpop.f32.mrf.mxu0 }
 0xc7f   :  { %v1189_v37 = vpop.f32.mrf.mxu0 }
 0xc81   :  { %v3062_v38 = vpop.f32.mrf.mxu0 }
 0xc82   :  { %v2811_v38 = vld [vmem:[#allocation8 + $0x2] ss:$0 sm:$0xff] }
 0xd13   :  { %v1234_v39 = vpop.f32.mrf.mxu1 }
 0xd14   :  { %v1240_v41 = vpack.c.bf16 %v1234_v39, %v1186_v35 }
 0xd15   :  { %v3067_v43 = vpop.f32.mrf.mxu1 }
 0xd16   :  { %3072 = vmatmul.mubr.msk.bf16.vlgmr.msra.gmra.mxu0 %vm203_vm6, %v1240_v41 }
 0xd17   :  { %v1237_v45 = vpop.f32.mrf.mxu1  ;;  %3087 = vmatprep.mubr.msk.bf16.mxu0 %vm3467_vm1, %v3466_v15  ;;  %3084 = vmatpush3.bf16.msra.mxu0 %v3258_v16 }
 0xd18   :  { %3085 = vmatprep.subr.bf16.mxu0 %v3466_v15 }
 0xd19   :  { %v3068_v47 = vpop.f32.mrf.mxu1 }
 0xd1b   :  { %3086 = vmatpush3.bf16.msra.mxu0 %v3259_v17 }
 0xd1c   :  { %3097 = vmatprep.subr.bf16.mxu0 %v3466_v15 }
 0xd1e   :  { %3088 = vmatmul.mubr.msk.bf16.vlgmr.msra.gmra.mxu0 %vm86_vm0, %v1413_v40 }
 0xd1f   :  { %3099 = vmatprep.mubr.msk.bf16.mxu0 %vm3467_vm1, %v3466_v15 }
 0xdd6   :  { %v1286_v49 = vpop.f32.mrf.mxu0 }
 0xdd7   :  { %v1293_v50 = vadd.f32 %v1286_v49, %v1018_v7 }
 0xdd8   :  { %v3073_v51 = vpop.f32.mrf.mxu0 }
 0xdd9   :  { %v1299_v52 = vadd.f32 %v2806_v48, %v1293_v50 }
 0xdda   :  { %v1289_v55 = vpop.f32.mrf.mxu0 }
 0xddb   :  { %v3763_v56 = vadd.f32 %v1299_v52, %v3524_v0  ;;  %v1294_v58 = vadd.f32 %v1289_v55, %v1019_v11  ;;  %v2807_v55 = vld [vmem:[#allocation8 + $0x1] ss:$0 sm:$0xff] }
 0xddc   :  { %v3074_v61 = vpop.f32.mrf.mxu0 }
 0xddd   :  { %v1300_v42 = vadd.f32 %v2806_v48, %v1294_v58  ;;  %v1303_v62 = vsel %vm86_vm0, %v3763_v56, 0.0 }
 0xdde   :  { %1304 = vadd.xlane.f32.xlu1 %v1303_v62  ;;  %v1472_v39 = vpop.f32.mrf.mxu0 }
 0xddf   :  { %v3768_v2 = vadd.f32 %v1300_v42, %v3526_v1  ;;  %v1473_v41 = vadd.f32 %v2811_v38, %v1472_v39 }
 0xde0   :  { %v3089_v43 = vpop.f32.mrf.mxu0 }
 0xde1   :  { %v1306_v4 = vsel %vm86_vm0, %v3768_v2, 0.0  ;;  %v3792_v45 = vpack.c.bf16 %v1473_v41, %v1473_v41 }
 0xde2   :  { %1307 = vadd.xlane.f32.xlu0 %v1306_v4  ;;  %v1475_v47 = vpop.f32.mrf.mxu0 }
 0xde3   :  { %v1476_v48 = vadd.f32 %v2811_v38, %v1475_v47  ;;  %v1500_v49 = vsel %vm203_vm6, %v3792_v45, 0 }
 0xde4   :  { %v3090_v50 = vpop.f32.mrf.mxu0 }
 0xde5   :  { %v3796_v51 = vpack.c.bf16 %v1476_v48, %v1476_v48 }
 0xde7   :  { %v1550_v52 = vsel %vm203_vm6, %v3796_v51, 0 }
 0xde8   :  { %3098 = vmatpush3.bf16.xpose.msra.mxu0 %v1550_v52 }
 0xde9   :  { %3109 = vmatprep.subr.bf16.mxu0 %v3466_v15 }
 0xe67   :  { %v1305_v5 = vpop.xlane.xlu1 %1304 }
 0xe68   :  { %v1309_v6 = vmul.f32 0.03125, %v1305_v5 }
 0xe6a   :  { %v1311_v7 = vsub.f32 %v3763_v56, %v1309_v6 }
 0xe6b   :  { %v1308_v0 = vpop.xlane.xlu0 %1307 }
 0xe6c   :  { %v1310_v8 = vmul.f32 0.03125, %v1308_v0  ;;  %v1313_v9 = vmul.f32 %v1311_v7, %v1311_v7 }
 0xe6e   :  { %v1312_v10 = vsub.f32 %v3768_v2, %v1310_v8  ;;  %v1315_v11 = vsel %vm86_vm0, %v1313_v9, 0.0 }
 0xe6f   :  { %1316 = vadd.xlane.f32.xlu0 %v1315_v11 }
 0xe70   :  { %v1314_v12 = vmul.f32 %v1312_v10, %v1312_v10 }
 0xe72   :  { %v1318_v1 = vsel %vm86_vm0, %v1314_v12, 0.0 }
 0xe73   :  { %1319 = vadd.xlane.f32.xlu1 %v1318_v1 }
 0xe84   :  { %1363 = vrot.lane.b32.xlu1 %v3257_v13, %s3479_s22 }
 0xe85   :  { %1365 = vrot.lane.b32.xlu0 %v3256_v14, %s3479_s22 }
 0xe88   :  { %1493 = vrot.lane.b32.xlu1 %v3568_v53, %s3471_s12 }
 0xe8c   :  { %1543 = vrot.lane.b32.xlu1 %v3572_v57, %s3471_s12 }
 0xef8   :  { %v1317_v53 = vpop.xlane.xlu0 %1316 }
 0xef9   :  { %v1321_v63 = vmul.f32 0.032258064, %v1317_v53 }
 0xefb   :  { %3302 = vrsqrt.f32 %v1321_v63  ;;  %vm1325_vm10 = vcmp.eq.f32.partialorder %v1321_v63, inf  ;;  %v1328_v23 = vand.u32 2147483648, %v1321_v63  ;;  %vm1327_vm11 = vcmp.eq.f32.partialorder %v1321_v63, 0.0 }
 0xefc   :  { %v1320_v57 = vpop.xlane.xlu1 %1319  ;;  %v1366_v20 = vpop.permute.xlu0 %1365 }
 0xefd   :  { %v1322_v21 = vmul.f32 0.032258064, %v1320_v57  ;;  %3076 = vmatpush3.bf16.msra.mxu1 %v1366_v20 }
 0xefe   :  { %3077 = vmatprep.subr.bf16.mxu1 %v3466_v15 }
 0xeff   :  { %3304 = vrsqrt.f32 %v1322_v21  ;;  %vm1332_vm12 = vcmp.eq.f32.partialorder %v1322_v21, inf  ;;  %v1335_v30 = vand.u32 2147483648, %v1322_v21  ;;  %vm1334_vm13 = vcmp.eq.f32.partialorder %v1322_v21, 0.0 }
 0xf00   :  { %v1364_v22 = vpop.permute.xlu1 %1363 }
 0xf01   :  { %3078 = vmatpush3.bf16.msra.mxu1 %v1364_v22 }
 0xf02   :  { %3091 = vmatprep.subr.bf16.mxu1 %v3466_v15 }
 0xf04   :  { %v3814_v0 = vpop.permute.xlu1 %1493 }
 0xf08   :  { %v3303_v44 = vpop.eup %3302  ;;  %v3817_v11 = vpop.permute.xlu1 %1543 }
 0xf09   :  { %v1324_v3 = vmul.f32 %v3303_v44, %v1321_v63 }
 0xf0b   :  { %v1326_v24 = vsel %vm1325_vm10, %v1321_v63, %v1324_v3 }
 0xf0c   :  { %v3305_v25 = vpop.eup %3304  ;;  %v1329_v26 = vsel %vm1327_vm11, %v1328_v23, %v1326_v24 }
 0xf0d   :  { %v1337_v28 = vadd.f32 1e-06, %v1329_v26  ;;  %v1331_v29 = vmul.f32 %v3305_v25, %v1322_v21 }
 0xf0f   :  { %v1333_v31 = vsel %vm1332_vm12, %v1322_v21, %v1331_v29  ;;  %3306 = vrcp.f32 %v1337_v28 }
 0xf10   :  { %v1336_v32 = vsel %vm1334_vm13, %v1335_v30, %v1333_v31 }
 0xf11   :  { %v1338_v33 = vadd.f32 1e-06, %v1336_v32 }
 0xf13   :  { %3308 = vrcp.f32 %v1338_v33 }
 0xf1c   :  { %v3307_v46 = vpop.eup %3306 }
 0xf1d   :  { %v1340_v35 = vmul.f32 %v3307_v46, %v1311_v7 }
 0xf20   :  { %v3309_v34 = vpop.eup %3308 }
 0xf21   :  { %v1342_v36 = vmul.f32 %v3309_v34, %v1312_v10 }
 0xf23   :  { %v1343_v37 = vpack.c.bf16 %v1342_v36, %v1340_v35 }
 0xf25   :  { %3080 = vmatmul.mubr.msk.bf16.vlgmr.msra.gmra.mxu1 %vm86_vm0, %v1343_v37 }
 0xf26   :  { %3093 = vmatprep.mubr.msk.bf16.mxu1 %vm3467_vm1, %v3466_v15  ;;  %3092 = vmatpush3.bf16.xpose.msra.mxu1 %v1500_v49 }
 0xf27   :  { %3103 = vmatprep.subr.bf16.mxu1 %v3466_v15 }
 0xfe5   :  { %v1406_v58 = vpop.f32.mrf.mxu1 }
 0xfe6   :  { %v1407_v61 = vadd.f32 %v2807_v55, %v1406_v58 }
 0xfe7   :  { %v3081_v42 = vpop.f32.mrf.mxu1 }
 0xfe8   :  { %v3802_v62 = vpack.c.bf16 %v1407_v61, %v1407_v61 }
 0xfe9   :  { %v1409_v4 = vpop.f32.mrf.mxu1 }
 0xfea   :  { %v1410_v5 = vadd.f32 %v2807_v55, %v1409_v4  ;;  %3094 = vmatmul.mubr.msk.bf16.vlgmr.msra.gmra.mxu1 %vm203_vm6, %v3802_v62 }
 0xfeb   :  { %v3082_v6 = vpop.f32.mrf.mxu1  ;;  %3105 = vmatprep.mubr.msk.bf16.mxu1 %vm3467_vm1, %v3466_v15 }
 0xfec   :  { %v3808_v7 = vpack.c.bf16 %v1410_v5, %v1410_v5 }
 0xfee   :  { %3100 = vmatmul.mubr.msk.bf16.vlgmr.msra.gmra.mxu0 %vm203_vm6, %v3808_v7 }
 0xfef   :  { %3111 = vmatprep.mubr.msk.bf16.mxu0 %vm3467_vm1, %v3466_v15 }
0x10aa   :  { %v1536_v8 = vpop.f32.mrf.mxu1 }
0x10ab   :  { %v1537_v9 = vadd.f32 %v1536_v8, %v3814_v0 }
0x10ac   :  { %v3095_v10 = vpop.f32.mrf.mxu1 }
0x10ad   :  { %v1592_v12 = vsel %vm203_vm6, %v1537_v9, -inf }
0x10ae   :  { %v1586_v1 = vpop.f32.mrf.mxu0  ;;  %1593 = vmax.xlane.f32.xlu0 %v1592_v12  ;;  %v1539_v13 = vpop.f32.mrf.mxu1 }
0x10af   :  { %v1587_v14 = vadd.f32 %v1586_v1, %v3817_v11 }
0x10b0   :  { %v3096_v16 = vpop.f32.mrf.mxu1  ;;  %v3101_v17 = vpop.f32.mrf.mxu0 }
0x10b1   :  { %v1595_v18 = vsel %vm203_vm6, %v1587_v14, -inf }
0x10b2   :  { %1596 = vmax.xlane.f32.xlu1 %v1595_v18  ;;  %v1589_v19 = vpop.f32.mrf.mxu0 }
0x10b4   :  { %v3102_v40 = vpop.f32.mrf.mxu0 }
0x10c3   :  { %1664 = vrot.lane.b32.xlu1 %v3796_v51, %s3468_s2 }
0x10c7   :  { %1715 = vrot.lane.b32.xlu1 %v3792_v45, %s3471_s12 }
0x10cb   :  { %1765 = vrot.lane.b32.xlu1 %v3796_v51, %s3471_s12 }
0x10cf   :  { %1763 = vrot.lane.b32.xlu1 %v3808_v7, %s3471_s12 }
0x1137   :  { %v1594_v53 = vpop.xlane.xlu0 %1593 }
0x1138   :  { %v1598_v63 = vsub.f32 %v1537_v9, %v1594_v53 }
0x113a   :  { %v1600_v57 = vmul.f32 1.442695, %v1598_v63 }
0x113b   :  { %v1597_v20 = vpop.xlane.xlu1 %1596 }
0x113c   :  { %3310 = vpow2.f32 %v1600_v57  ;;  %v1599_v21 = vsub.f32 %v1587_v14, %v1597_v20 }
0x113e   :  { %v1602_v22 = vmul.f32 1.442695, %v1599_v21 }
0x113f   :  { %v1665_v44 = vpop.permute.xlu1 %1664 }
0x1140   :  { %3312 = vpow2.f32 %v1602_v22  ;;  %v1670_v3 = vsel %vm327_vm9, %v1665_v44, 0 }
0x1141   :  { %3110 = vmatpush3.bf16.msra.mxu0 %v1670_v3 }
0x1142   :  { %3121 = vmatprep.subr.bf16.mxu0 %v3466_v15 }
0x1143   :  { %v1716_v33 = vpop.permute.xlu1 %1715 }
0x1144   :  { %v1721_v36 = vsel %vm203_vm6, %v1716_v33, 0 }
0x1147   :  { %v1766_v38 = vpop.permute.xlu1 %1765 }
0x1148   :  { %v1771_v41 = vsel %vm203_vm6, %v1766_v38, 0 }
0x1149   :  { %v3311_v23 = vpop.eup %3310 }
0x114a   :  { %v1604_v24 = vsel %vm203_vm6, %v3311_v23, 0.0 }
0x114b   :  { %1605 = vadd.xlane.f32.xlu0 %v1604_v24  ;;  %v1764_v47 = vpop.permute.xlu1 %1763 }
0x114d   :  { %v3313_v25 = vpop.eup %3312 }
0x114e   :  { %v1607_v26 = vsel %vm203_vm6, %v3313_v25, 0.0 }
0x114f   :  { %1608 = vadd.xlane.f32.xlu0 %v1607_v26 }
0x1165   :  { %1616 = vrot.lane.b32.xlu0 %v3792_v45, %s3468_s2 }
0x1169   :  { %1713 = vrot.lane.b32.xlu0 %v3802_v62, %s3471_s12 }
0x11d4   :  { %v1606_v28 = vpop.xlane.xlu0 %1605 }
0x11d5   :  { %3314 = vrcp.f32 %v1606_v28 }
0x11d8   :  { %v1609_v29 = vpop.xlane.xlu0 %1608 }
0x11d9   :  { %3316 = vrcp.f32 %v1609_v29 }
0x11dc   :  { %v1617_v30 = vpop.permute.xlu0 %1616 }
0x11dd   :  { %v1622_v31 = vsel %vm327_vm9, %v1617_v30, 0 }
0x11de   :  { %3104 = vmatpush3.bf16.msra.mxu1 %v1622_v31 }
0x11df   :  { %3115 = vmatprep.subr.bf16.mxu1 %v3466_v15 }
0x11e0   :  { %v1714_v43 = vpop.permute.xlu0 %1713 }
0x11e2   :  { %v3315_v32 = vpop.eup %3314 }
0x11e3   :  { %v1612_v46 = vmul.f32 %v3315_v32, %v3311_v23 }
0x11e5   :  { %v1614_v34 = vpack.c.bf16 %v1612_v46, %v1612_v46 }
0x11e6   :  { %v3317_v35 = vpop.eup %3316 }
0x11e7   :  { %3106 = vmatmul.mubr.msk.bf16.vlgmr.msra.gmra.mxu1 %vm203_vm6, %v1614_v34  ;;  %v1613_v37 = vmul.f32 %v3317_v35, %v3313_v25 }
0x11e8   :  { %3116 = vmatpush3.bf16.xpose.msra.mxu1 %v1721_v36  ;;  %3117 = vmatprep.mubr.msk.bf16.mxu1 %vm3467_vm1, %v3466_v15 }
0x11e9   :  { %v1615_v39 = vpack.c.bf16 %v1613_v37, %v1613_v37  ;;  %3127 = vmatprep.subr.bf16.mxu1 %v3466_v15 }
0x11eb   :  { %3112 = vmatmul.mubr.msk.bf16.vlgmr.msra.gmra.mxu0 %vm203_vm6, %v1615_v39 }
0x11ec   :  { %3122 = vmatpush3.bf16.xpose.msra.mxu0 %v1771_v41  ;;  %3123 = vmatprep.mubr.msk.bf16.mxu0 %vm3467_vm1, %v3466_v15 }
0x11ed   :  { %3133 = vmatprep.subr.bf16.mxu0 %v3466_v15 }
0x11ef   :  { %3118 = vmatmul.mubr.msk.bf16.vlgmr.msra.gmra.mxu1 %vm203_vm6, %v1714_v43 }
0x11f0   :  { %3129 = vmatprep.mubr.msk.bf16.mxu1 %vm3467_vm1, %v3466_v15 }
0x11f3   :  { %3124 = vmatmul.mubr.msk.bf16.vlgmr.msra.gmra.mxu0 %vm203_vm6, %v1764_v47 }
0x11f4   :  { %3135 = vmatprep.mubr.msk.bf16.mxu0 %vm3467_vm1, %v3466_v15 }
0x12a7   :  { %v3856_v48 = vpop.f32.mrf.mxu1 }
0x12a9   :  { %v3107_v49 = vpop.f32.mrf.mxu1 }
0x12ab   :  { %v1661_v50 = vpop.f32.mrf.mxu1  ;;  %v3858_v52 = vpop.f32.mrf.mxu0 }
0x12ac   :  { %v1712_v55 = vpack.c.bf16 %v3858_v52, %v3856_v48 }
0x12ad   :  { %v3108_v58 = vpop.f32.mrf.mxu1  ;;  %v3113_v61 = vpop.f32.mrf.mxu0 }
0x12af   :  { %v1709_v42 = vpop.f32.mrf.mxu0  ;;  %v1757_v4 = vpop.f32.mrf.mxu1 }
0x12b0   :  { %v1758_v5 = vadd.f32 %v1757_v4, %v3814_v0 }
0x12b1   :  { %v3114_v6 = vpop.f32.mrf.mxu0  ;;  %v3119_v8 = vpop.f32.mrf.mxu1 }
0x12b2   :  { %v1813_v9 = vsel %vm203_vm6, %v1758_v5, -inf }
0x12b3   :  { %v1807_v10 = vpop.f32.mrf.mxu0  ;;  %1814 = vmax.xlane.f32.xlu0 %v1813_v9  ;;  %v1760_v12 = vpop.f32.mrf.mxu1 }
0x12b4   :  { %v1808_v1 = vadd.f32 %v1807_v10, %v3817_v11 }
0x12b5   :  { %v3120_v13 = vpop.f32.mrf.mxu1  ;;  %v3125_v14 = vpop.f32.mrf.mxu0 }
0x12b6   :  { %v1816_v16 = vsel %vm203_vm6, %v1808_v1, -inf }
0x12b7   :  { %1817 = vmax.xlane.f32.xlu1 %v1816_v16  ;;  %v1810_v17 = vpop.f32.mrf.mxu0 }
0x12b9   :  { %v3126_v18 = vpop.f32.mrf.mxu0 }
0x12c8   :  { %1885 = vrot.lane.b32.xlu1 %v3796_v51, %s3470_s11 }
0x12cc   :  { %1934 = vrot.lane.b32.xlu1 %v3622_v59, %s3479_s22 }
0x12d0   :  { %1983 = vrot.lane.b32.xlu1 %v3626_v60, %s3479_s22 }
0x12d4   :  { %2084 = vrot.lane.b32.xlu1 %v3796_v51, %s3474_s15 }
0x12d8   :  { %2082 = vrot.lane.b32.xlu1 %v3808_v7, %s3474_s15 }
0x133c   :  { %v1815_v19 = vpop.xlane.xlu0 %1814 }
0x133d   :  { %v1819_v40 = vsub.f32 %v1758_v5, %v1815_v19 }
0x133f   :  { %v1821_v53 = vmul.f32 1.442695, %v1819_v40 }
0x1340   :  { %v1818_v63 = vpop.xlane.xlu1 %1817 }
0x1341   :  { %3318 = vpow2.f32 %v1821_v53  ;;  %v1820_v57 = vsub.f32 %v1808_v1, %v1818_v63 }
0x1343   :  { %v1823_v20 = vmul.f32 1.442695, %v1820_v57 }
0x1344   :  { %v1886_v21 = vpop.permute.xlu1 %1885 }
0x1345   :  { %3320 = vpow2.f32 %v1823_v20  ;;  %v1891_v59 = vsel %vm327_vm9, %v1886_v21, 0 }
0x1346   :  { %3134 = vmatpush3.bf16.msra.mxu0 %v1891_v59 }
0x1347   :  { %3145 = vmatprep.subr.bf16.mxu0 %v3466_v15 }
0x1348   :  { %v1935_v29 = vpop.permute.xlu1 %1934 }
0x1349   :  { %v1940_v31 = vsel %vm327_vm9, %v1935_v29, 0 }
0x134c   :  { %v1984_v34 = vpop.permute.xlu1 %1983 }
0x134d   :  { %v1989_v35 = vsel %vm327_vm9, %v1984_v34, 0 }
0x134e   :  { %v3319_v60 = vpop.eup %3318 }
0x134f   :  { %v1825_v22 = vsel %vm203_vm6, %v3319_v60, 0.0 }
0x1350   :  { %1826 = vadd.xlane.f32.xlu0 %v1825_v22  ;;  %v2085_v37 = vpop.permute.xlu1 %2084 }
0x1351   :  { %v2090_v38 = vsel %vm203_vm6, %v2085_v37, 0 }
0x1352   :  { %v3321_v44 = vpop.eup %3320 }
0x1353   :  { %v1828_v3 = vsel %vm203_vm6, %v3321_v44, 0.0 }
0x1354   :  { %1829 = vadd.xlane.f32.xlu0 %v1828_v3  ;;  %v2083_v39 = vpop.permute.xlu1 %2082 }
0x136a   :  { %1837 = vrot.lane.b32.xlu0 %v3792_v45, %s3470_s11 }
0x136e   :  { %2034 = vrot.lane.b32.xlu0 %v3792_v45, %s3474_s15 }
0x1372   :  { %2032 = vrot.lane.b32.xlu0 %v3802_v62, %s3474_s15 }
0x13d9   :  { %v1827_v23 = vpop.xlane.xlu0 %1826 }
0x13da   :  { %3322 = vrcp.f32 %v1827_v23 }
0x13dd   :  { %v1830_v24 = vpop.xlane.xlu0 %1829 }
0x13de   :  { %3324 = vrcp.f32 %v1830_v24 }
0x13e1   :  { %v1838_v25 = vpop.permute.xlu0 %1837 }
0x13e2   :  { %v1843_v26 = vsel %vm327_vm9, %v1838_v25, 0 }
0x13e3   :  { %3128 = vmatpush3.bf16.msra.mxu1 %v1843_v26 }
0x13e4   :  { %3139 = vmatprep.subr.bf16.mxu1 %v3466_v15 }
0x13e5   :  { %v2035_v47 = vpop.permute.xlu0 %2034 }
0x13e6   :  { %v2040_v58 = vsel %vm203_vm6, %v2035_v47, 0 }
0x13e7   :  { %v3323_v28 = vpop.eup %3322 }
0x13e8   :  { %v1833_v30 = vmul.f32 %v3323_v28, %v3319_v60 }
0x13e9   :  { %v2033_v5 = vpop.permute.xlu0 %2032 }
0x13ea   :  { %v1835_v32 = vpack.c.bf16 %v1833_v30, %v1833_v30 }
0x13eb   :  { %v3325_v33 = vpop.eup %3324 }
0x13ec   :  { %3130 = vmatmul.mubr.msk.bf16.vlgmr.msra.gmra.mxu1 %vm203_vm6, %v1835_v32  ;;  %v1834_v46 = vmul.f32 %v3325_v33, %v3321_v44 }
0x13ed   :  { %3140 = vmatpush3.bf16.msra.mxu1 %v1940_v31  ;;  %3141 = vmatprep.mubr.msk.bf16.mxu1 %vm3467_vm1, %v3466_v15 }
0x13ee   :  { %v1836_v36 = vpack.c.bf16 %v1834_v46, %v1834_v46  ;;  %3151 = vmatprep.subr.bf16.mxu1 %v3466_v15 }
0x13f0   :  { %3136 = vmatmul.mubr.msk.bf16.vlgmr.msra.gmra.mxu0 %vm203_vm6, %v1836_v36 }
0x13f1   :  { %3146 = vmatpush3.bf16.msra.mxu0 %v1989_v35  ;;  %3147 = vmatprep.mubr.msk.bf16.mxu0 %vm3467_vm1, %v3466_v15 }
0x13f2   :  { %3157 = vmatprep.subr.bf16.mxu0 %v3466_v15 }
0x13f8   :  { %3148 = vmatmul.mubr.msk.bf16.vlgmr.msra.gmra.mxu0 %vm203_vm6, %v1712_v55 }
0x13f9   :  { %3158 = vmatpush3.bf16.xpose.msra.mxu0 %v2090_v38  ;;  %3159 = vmatprep.mubr.msk.bf16.mxu0 %vm3467_vm1, %v3466_v15 }
0x13fa   :  { %3169 = vmatprep.subr.bf16.mxu0 %v3466_v15 }
0x1400   :  { %3160 = vmatmul.mubr.msk.bf16.vlgmr.msra.gmra.mxu0 %vm203_vm6, %v2083_v39 }
0x1401   :  { %3171 = vmatprep.mubr.msk.bf16.mxu0 %vm3467_vm1, %v3466_v15 }
0x14ac   :  { %v1879_v41 = vpop.f32.mrf.mxu1 }
0x14ae   :  { %v3131_v43 = vpop.f32.mrf.mxu1 }
0x14b0   :  { %v1882_v49 = vpop.f32.mrf.mxu1  ;;  %v1927_v50 = vpop.f32.mrf.mxu0 }
0x14b1   :  { %v1933_v48 = vpack.c.bf16 %v1927_v50, %v1879_v41 }
0x14b2   :  { %v3132_v52 = vpop.f32.mrf.mxu1  ;;  %v3137_v55 = vpop.f32.mrf.mxu0 }
0x14b3   :  { %3142 = vmatmul.mubr.msk.bf16.vlgmr.msra.gmra.mxu1 %vm203_vm6, %v1933_v48 }
0x14b4   :  { %3152 = vmatpush3.bf16.xpose.msra.mxu1 %v2040_v58  ;;  %v1930_v61 = vpop.f32.mrf.mxu0  ;;  %3153 = vmatprep.mubr.msk.bf16.mxu1 %vm3467_vm1, %v3466_v15 }
0x14b5   :  { %3163 = vmatprep.subr.bf16.mxu1 %v3466_v15 }
0x14b6   :  { %v3138_v42 = vpop.f32.mrf.mxu0 }
0x14b8   :  { %v3914_v4 = vpop.f32.mrf.mxu0 }
0x14ba   :  { %v3149_v6 = vpop.f32.mrf.mxu0 }
0x14bb   :  { %3154 = vmatmul.mubr.msk.bf16.vlgmr.msra.gmra.mxu1 %vm203_vm6, %v2033_v5 }
0x14bc   :  { %v3917_v8 = vpop.f32.mrf.mxu0  ;;  %3165 = vmatprep.mubr.msk.bf16.mxu1 %vm3467_vm1, %v3466_v15 }
0x14be   :  { %v3150_v9 = vpop.f32.mrf.mxu0 }
0x14c0   :  { %v2126_v10 = vpop.f32.mrf.mxu0 }
0x14c1   :  { %v2127_v12 = vadd.f32 %v2126_v10, %v3817_v11 }
0x14c2   :  { %v3161_v1 = vpop.f32.mrf.mxu0 }
0x14c3   :  { %v2135_v13 = vsel %vm203_vm6, %v2127_v12, -inf }
0x14c4   :  { %2136 = vmax.xlane.f32.xlu1 %v2135_v13  ;;  %v2129_v14 = vpop.f32.mrf.mxu0 }
0x14c6   :  { %v3162_v16 = vpop.f32.mrf.mxu0 }
0x14d5   :  { %2204 = vrot.lane.b32.xlu1 %v3796_v51, %s3473_s14 }
0x14d9   :  { %2253 = vrot.lane.b32.xlu1 %v3682_v54, %s3479_s22 }
0x14dd   :  { %2306 = vrot.lane.b32.xlu1 %v3792_v45, %s3477_s18 }
0x14e1   :  { %2304 = vrot.lane.b32.xlu1 %v3802_v62, %s3477_s18 }
0x154d   :  { %v2137_v17 = vpop.xlane.xlu1 %2136 }
0x154e   :  { %v2139_v40 = vsub.f32 %v2127_v12, %v2137_v17 }
0x1550   :  { %v2142_v53 = vmul.f32 1.442695, %v2139_v40 }
0x1551   :  { %v2205_v18 = vpop.permute.xlu1 %2204 }
0x1552   :  { %v2210_v19 = vsel %vm327_vm9, %v2205_v18, 0  ;;  %3326 = vpow2.f32 %v2142_v53 }
0x1553   :  { %3170 = vmatpush3.bf16.msra.mxu0 %v2210_v19 }
0x1554   :  { %3181 = vmatprep.subr.bf16.mxu0 %v3466_v15 }
0x1555   :  { %v2254_v29 = vpop.permute.xlu1 %2253 }
0x1556   :  { %v2259_v47 = vsel %vm327_vm9, %v2254_v29, 0 }
0x1559   :  { %v2307_v46 = vpop.permute.xlu1 %2306 }
0x155a   :  { %v2312_v35 = vsel %vm203_vm6, %v2307_v46, 0 }
0x155d   :  { %v2305_v36 = vpop.permute.xlu1 %2304 }
0x155f   :  { %v3327_v22 = vpop.eup %3326 }
0x1560   :  { %v2147_v23 = vsel %vm203_vm6, %v3327_v22, 0.0 }
0x1573   :  { %v3933_v63 = vpop.f32.mrf.mxu1 }
0x1574   :  { %v2026_v40 = vadd.f32 %v3914_v4, %v3933_v63 }
0x1575   :  { %v3143_v57 = vpop.f32.mrf.mxu1 }
0x1577   :  { %v3935_v54 = vpop.f32.mrf.mxu1 }
0x1579   :  { %v3144_v20 = vpop.f32.mrf.mxu1 }
0x157b   :  { %v2076_v21 = vpop.f32.mrf.mxu1 }
0x157c   :  { %v2077_v59 = vadd.f32 %v2076_v21, %v3814_v0  ;;  %v2029_v21 = vadd.f32 %v3917_v8, %v3935_v54 }
0x157d   :  { %v3155_v62 = vpop.f32.mrf.mxu1 }
0x157e   :  { %v2132_v60 = vsel %vm203_vm6, %v2077_v59, -inf }
0x157f   :  { %2133 = vmax.xlane.f32.xlu0 %v2132_v60  ;;  %v2079_v44 = vpop.f32.mrf.mxu1 }
0x1581   :  { %v3156_v3 = vpop.f32.mrf.mxu1 }
0x1583   :  { %2148 = vadd.xlane.f32.xlu0 %v2147_v23 }
0x1608   :  { %v2134_v24 = vpop.xlane.xlu0 %2133 }
0x1609   :  { %v2138_v25 = vsub.f32 %v2077_v59, %v2134_v24 }
0x160b   :  { %v2140_v26 = vmul.f32 1.442695, %v2138_v25 }
0x160c   :  { %v2149_v28 = vpop.xlane.xlu0 %2148 }
0x160d   :  { %3328 = vpow2.f32 %v2140_v26 }
0x160e   :  { %3330 = vrcp.f32 %v2149_v28 }
0x161a   :  { %v3329_v30 = vpop.eup %3328 }
0x161b   :  { %v3331_v31 = vpop.eup %3330  ;;  %v2144_v32 = vsel %vm203_vm6, %v3329_v30, 0.0 }
0x161c   :  { %2145 = vadd.xlane.f32.xlu0 %v2144_v32  ;;  %v2153_v33 = vmul.f32 %v3331_v31, %v3327_v22 }
0x161e   :  { %v2155_v34 = vpack.c.bf16 %v2153_v33, %v2153_v33 }
0x1620   :  { %3172 = vmatmul.mubr.msk.bf16.vlgmr.msra.gmra.mxu0 %vm203_vm6, %v2155_v34 }
0x1621   :  { %3182 = vmatpush3.bf16.xpose.msra.mxu0 %v2312_v35  ;;  %3183 = vmatprep.mubr.msk.bf16.mxu0 %vm3467_vm1, %v3466_v15 }
0x1622   :  { %3193 = vmatprep.subr.bf16.mxu0 %v3466_v15 }
0x1628   :  { %3184 = vmatmul.mubr.msk.bf16.vlgmr.msra.gmra.mxu0 %vm203_vm6, %v2305_v36 }
0x1629   :  { %3195 = vmatprep.mubr.msk.bf16.mxu0 %vm3467_vm1, %v3466_v15 }
0x1632   :  { %2156 = vrot.lane.b32.xlu0 %v3792_v45, %s3473_s14 }
0x1636   :  { %2356 = vrot.lane.b32.xlu0 %v3796_v51, %s3477_s18 }
0x163a   :  { %2354 = vrot.lane.b32.xlu0 %v3808_v7, %s3477_s18 }
0x16a5   :  { %v2146_v37 = vpop.xlane.xlu0 %2145 }
0x16a6   :  { %3332 = vrcp.f32 %v2146_v37 }
0x16a9   :  { %v2157_v38 = vpop.permute.xlu0 %2156 }
0x16aa   :  { %v2162_v39 = vsel %vm327_vm9, %v2157_v38, 0 }
0x16ab   :  { %3164 = vmatpush3.bf16.msra.mxu1 %v2162_v39 }
0x16ac   :  { %3175 = vmatprep.subr.bf16.mxu1 %v3466_v15 }
0x16ad   :  { %v2357_v10 = vpop.permute.xlu0 %2356 }
0x16ae   :  { %v2362_v16 = vsel %vm203_vm6, %v2357_v10, 0 }
0x16b3   :  { %v3333_v41 = vpop.eup %3332 }
0x16b4   :  { %v2152_v43 = vmul.f32 %v3333_v41, %v3329_v30 }
0x16b6   :  { %v2154_v49 = vpack.c.bf16 %v2152_v43, %v2152_v43 }
0x16b8   :  { %3166 = vmatmul.mubr.msk.bf16.vlgmr.msra.gmra.mxu1 %vm203_vm6, %v2154_v49 }
0x16b9   :  { %3176 = vmatpush3.bf16.msra.mxu1 %v2259_v47  ;;  %3177 = vmatprep.mubr.msk.bf16.mxu1 %vm3467_vm1, %v3466_v15 }
0x16ba   :  { %3187 = vmatprep.subr.bf16.mxu1 %v3466_v15 }
0x16e0   :  { %v2246_v7 = vpop.f32.mrf.mxu0 }
0x16e2   :  { %v3173_v50 = vpop.f32.mrf.mxu0 }
0x16e4   :  { %v2249_v48 = vpop.f32.mrf.mxu0 }
0x16e6   :  { %v3174_v52 = vpop.f32.mrf.mxu0 }
0x16e8   :  { %v2348_v55 = vpop.f32.mrf.mxu0 }
0x16e9   :  { %v2349_v58 = vadd.f32 %v2348_v55, %v3814_v0  ;;  %v2839_v55 = vld [vmem:[#allocation8 + $0x4] ss:$0 sm:$0xff] }
0x16ea   :  { %v3185_v61 = vpop.f32.mrf.mxu0 }
0x16eb   :  { %v2404_v42 = vsel %vm203_vm6, %v2349_v58, -inf }
0x16ec   :  { %2405 = vmax.xlane.f32.xlu1 %v2404_v42  ;;  %v2351_v5 = vpop.f32.mrf.mxu0 }
0x16ee   :  { %v3186_v6 = vpop.f32.mrf.mxu0 }
0x16fd   :  { %2428 = vrot.lane.b32.xlu1 %v3792_v45, %s3476_s17  ;;  %v2355_v45 = vpop.permute.xlu0 %2354 }
0x1701   :  { %2525 = vrot.lane.b32.xlu1 %v3748_v27, %s3479_s22 }
0x1775   :  { %v2406_v9 = vpop.xlane.xlu1 %2405 }
0x1776   :  { %v2410_v18 = vsub.f32 %v2349_v58, %v2406_v9 }
0x1778   :  { %v2198_v12 = vpop.f32.mrf.mxu1  ;;  %v2412_v19 = vmul.f32 1.442695, %v2410_v18 }
0x1779   :  { %v2429_v1 = vpop.permute.xlu1 %2428  ;;  %v2252_v13 = vpack.c.bf16 %v2246_v7, %v2198_v12 }
0x177a   :  { %v2434_v14 = vsel %vm327_vm9, %v2429_v1, 0  ;;  %v3167_v0 = vpop.f32.mrf.mxu1  ;;  %3334 = vpow2.f32 %v2412_v19 }
0x177b   :  { %3194 = vmatpush3.bf16.msra.mxu0 %v2434_v14  ;;  %3178 = vmatmul.mubr.msk.bf16.vlgmr.msra.gmra.mxu1 %vm203_vm6, %v2252_v13 }
0x177c   :  { %3188 = vmatpush3.bf16.xpose.msra.mxu1 %v2362_v16  ;;  %v2201_v17 = vpop.f32.mrf.mxu1  ;;  %3189 = vmatprep.mubr.msk.bf16.mxu1 %vm3467_vm1, %v3466_v15 }
0x177d   :  { %3199 = vmatprep.subr.bf16.mxu1 %v3466_v15  ;;  %3205 = vmatprep.subr.bf16.mxu0 %v3466_v15  ;;  %v2526_v33 = vpop.permute.xlu1 %2525 }
0x177e   :  { %v3168_v27 = vpop.f32.mrf.mxu1  ;;  %v2531_v46 = vsel %vm327_vm9, %v2526_v33, 0 }
0x1783   :  { %3190 = vmatmul.mubr.msk.bf16.vlgmr.msra.gmra.mxu1 %vm203_vm6, %v2355_v45 }
0x1784   :  { %3201 = vmatprep.mubr.msk.bf16.mxu1 %vm3467_vm1, %v3466_v15 }
0x1787   :  { %v3335_v24 = vpop.eup %3334 }
0x1788   :  { %v2416_v63 = vsel %vm203_vm6, %v3335_v24, 0.0 }
0x183b   :  { %v2295_v53 = vpop.f32.mrf.mxu1 }
0x183c   :  { %v2302_v57 = vadd.f32 %v2295_v53, %v2026_v40 }
0x183d   :  { %v3179_v20 = vpop.f32.mrf.mxu1 }
0x183e   :  { %v3261_v20 = vld [vmem:[#allocation7 + $0x8] ss:$12 sps:$4 sm:$0xff]  }
0x183f   :  { %v2298_v59 = vpop.f32.mrf.mxu1 }
0x1840   :  { %v2303_v62 = vadd.f32 %v2298_v59, %v2029_v21 }
0x1841   :  { %v3180_v60 = vpop.f32.mrf.mxu1 }
0x1843   :  { %v2398_v22 = vpop.f32.mrf.mxu1 }
0x1844   :  { %v2399_v44 = vadd.f32 %v2398_v22, %v3817_v11 }
0x1845   :  { %v3191_v3 = vpop.f32.mrf.mxu1 }
0x1846   :  { %v2407_v23 = vsel %vm203_vm6, %v2399_v44, -inf }
0x1847   :  { %2408 = vmax.xlane.f32.xlu0 %v2407_v23  ;;  %v2401_v25 = vpop.f32.mrf.mxu1 }
0x1849   :  { %v3192_v4 = vpop.f32.mrf.mxu1 }
0x184b   :  { %2417 = vadd.xlane.f32.xlu0 %v2416_v63 }
0x18d0   :  { %v2409_v26 = vpop.xlane.xlu0 %2408 }
0x18d1   :  { %v2411_v28 = vsub.f32 %v2399_v44, %v2409_v26 }
0x18d3   :  { %v2414_v29 = vmul.f32 1.442695, %v2411_v28 }
0x18d4   :  { %v2418_v8 = vpop.xlane.xlu0 %2417 }
0x18d5   :  { %3336 = vpow2.f32 %v2414_v29 }
0x18d6   :  { %3338 = vrcp.f32 %v2418_v8 }
0x18e2   :  { %v3337_v54 = vpop.eup %3336 }
0x18e3   :  { %v3339_v30 = vpop.eup %3338  ;;  %v2419_v11 = vsel %vm203_vm6, %v3337_v54, 0.0 }
0x18e4   :  { %2420 = vadd.xlane.f32.xlu0 %v2419_v11  ;;  %v2424_v31 = vmul.f32 %v3339_v30, %v3335_v24 }
0x18e6   :  { %v2426_v32 = vpack.c.bf16 %v2424_v31, %v2424_v31 }
0x18e8   :  { %3196 = vmatmul.mubr.msk.bf16.vlgmr.msra.gmra.mxu0 %vm203_vm6, %v2426_v32 }
0x18e9   :  { %3207 = vmatprep.mubr.msk.bf16.mxu0 %vm3467_vm1, %v3466_v15  ;;  %3206 = vmatpush3.bf16.msra.mxu0 %v2531_v46 }
0x18ea   :  { %3219 = vmatprep.subr.bf16.mxu0 %v3466_v15 }
0x18fa   :  { %2476 = vrot.lane.b32.xlu0 %v3796_v51, %s3476_s17 }
0x196d   :  { %v2421_v34 = vpop.xlane.xlu0 %2420 }
0x196e   :  { %3340 = vrcp.f32 %v2421_v34 }
0x1971   :  { %v2477_v35 = vpop.permute.xlu0 %2476 }
0x1972   :  { %v2482_v36 = vsel %vm327_vm9, %v2477_v35, 0  ;;  %v2840_v35 = vld [vmem:[#allocation8 + $0x5] ss:$0 sm:$0xff] }
0x1973   :  { %3200 = vmatpush3.bf16.msra.mxu1 %v2482_v36 }
0x1974   :  { %3211 = vmatprep.subr.bf16.mxu1 %v3466_v15 }
0x197b   :  { %v3341_v37 = vpop.eup %3340 }
0x197c   :  { %v2425_v38 = vmul.f32 %v3341_v37, %v3337_v54 }
0x197e   :  { %v2427_v39 = vpack.c.bf16 %v2425_v38, %v2425_v38 }
0x1980   :  { %3202 = vmatmul.mubr.msk.bf16.vlgmr.msra.gmra.mxu1 %vm203_vm6, %v2427_v39 }
0x1981   :  { %3215 = vmatprep.mubr.msk.bf16.mxu1 %vm3467_vm1, %v3466_v15 }
0x19a8   :  { %v2470_v51 = vpop.f32.mrf.mxu0 }
0x19aa   :  { %v3197_v41 = vpop.f32.mrf.mxu0 }
0x19ac   :  { %v2473_v43 = vpop.f32.mrf.mxu0 }
0x19ae   :  { %v3198_v47 = vpop.f32.mrf.mxu0 }
0x1a40   :  { %v2518_v49 = vpop.f32.mrf.mxu1 }
0x1a41   :  { %v2524_v7 = vpack.c.bf16 %v2518_v49, %v2470_v51 }
0x1a42   :  { %v3203_v50 = vpop.f32.mrf.mxu1 }
0x1a43   :  { %3208 = vmatmul.mubr.msk.bf16.vlgmr.msra.gmra.mxu0 %vm203_vm6, %v2524_v7  ;;  %v2844_v7 = vld [vmem:[#allocation8 + $0x6] ss:$0 sm:$0xff] }
0x1a44   :  { %v2521_v48 = vpop.f32.mrf.mxu1  ;;  %3223 = vmatprep.mubr.msk.bf16.mxu0 %vm3467_vm1, %v3466_v15 }
0x1a46   :  { %v3204_v52 = vpop.f32.mrf.mxu1 }
0x1b03   :  { %v2567_v58 = vpop.f32.mrf.mxu0 }
0x1b04   :  { %v2574_v61 = vadd.f32 %v2567_v58, %v2302_v57  ;;  %v3260_v57 = vld [vmem:[#allocation7 + $0x20] ss:$12 sps:$4 sm:$0xff]  }
0x1b05   :  { %v3209_v42 = vpop.f32.mrf.mxu0  ;;  %3212 = vmatpush3.bf16.msra.mxu1 %v3260_v57 }
0x1b06   :  { %v2580_v5 = vadd.f32 %v2839_v55, %v2574_v61  ;;  %3213 = vmatprep.subr.bf16.mxu1 %v3466_v15 }
0x1b07   :  { %v2570_v6 = vpop.f32.mrf.mxu0 }
0x1b08   :  { %v4002_v9 = vadd.f32 %v2580_v5, %v3763_v56  ;;  %v2575_v10 = vadd.f32 %v2570_v6, %v2303_v62 }
0x1b09   :  { %v3210_v12 = vpop.f32.mrf.mxu0  ;;  %3214 = vmatpush3.bf16.msra.mxu1 %v3261_v20 }
0x1b0a   :  { %v2581_v1 = vadd.f32 %v2839_v55, %v2575_v10  ;;  %v2584_v13 = vsel %vm86_vm0, %v4002_v9, 0.0 }
0x1b0b   :  { %2585 = vadd.xlane.f32.xlu1 %v2584_v13 }
0x1b0c   :  { %v4007_v14 = vadd.f32 %v2581_v1, %v3768_v2 }
0x1b0e   :  { %v2587_v0 = vsel %vm86_vm0, %v4007_v14, 0.0 }
0x1b0f   :  { %2588 = vadd.xlane.f32.xlu0 %v2587_v0 }
0x1b94   :  { %v2586_v16 = vpop.xlane.xlu1 %2585 }
0x1b95   :  { %v2590_v17 = vmul.f32 0.03125, %v2586_v16 }
0x1b97   :  { %v2592_v27 = vsub.f32 %v4002_v9, %v2590_v17 }
0x1b98   :  { %v2589_v56 = vpop.xlane.xlu0 %2588 }
0x1b99   :  { %v2591_v45 = vmul.f32 0.03125, %v2589_v56  ;;  %v2594_v18 = vmul.f32 %v2592_v27, %v2592_v27 }
0x1b9b   :  { %v2593_v19 = vsub.f32 %v4007_v14, %v2591_v45  ;;  %v2596_v40 = vsel %vm86_vm0, %v2594_v18, 0.0 }
0x1b9c   :  { %2597 = vadd.xlane.f32.xlu0 %v2596_v40 }
0x1b9d   :  { %v2595_v53 = vmul.f32 %v2593_v19, %v2593_v19 }
0x1b9f   :  { %v2599_v2 = vsel %vm86_vm0, %v2595_v53, 0.0 }
0x1ba0   :  { %2600 = vadd.xlane.f32.xlu1 %v2599_v2 }
0x1bb1   :  { %2698 = vrot.lane.b32.xlu1 %v3261_v20, %s3469_s3 }
0x1bb2   :  { %2700 = vrot.lane.b32.xlu0 %v3260_v57, %s3469_s3 }
0x1c25   :  { %v2598_v21 = vpop.xlane.xlu0 %2597 }
0x1c26   :  { %v2602_v59 = vmul.f32 0.032258064, %v2598_v21 }
0x1c28   :  { %3342 = vrsqrt.f32 %v2602_v59  ;;  %vm2606_vm15 = vcmp.eq.f32.partialorder %v2602_v59, inf  ;;  %v2609_v24 = vand.u32 2147483648, %v2602_v59  ;;  %vm2608_vm1 = vcmp.eq.f32.partialorder %v2602_v59, 0.0 }
0x1c29   :  { %v2601_v62 = vpop.xlane.xlu1 %2600  ;;  %v2701_v22 = vpop.permute.xlu0 %2700 }
0x1c2a   :  { %v2603_v60 = vmul.f32 0.032258064, %v2601_v62  ;;  %v2710_v3 = vsel %vm2702_vm14, %v2701_v22, 0 }
0x1c2b   :  { %3220 = vmatpush3.bf16.xpose.msra.mxu0 %v2710_v3 }
0x1c2c   :  { %3344 = vrsqrt.f32 %v2603_v60  ;;  %3221 = vmatprep.subr.bf16.mxu0 %v3466_v15  ;;  %vm2613_vm2 = vcmp.eq.f32.partialorder %v2603_v60, inf  ;;  %v2616_v29 = vand.u32 2147483648, %v2603_v60  ;;  %vm2615_vm3 = vcmp.eq.f32.partialorder %v2603_v60, 0.0 }
0x1c2d   :  { %v2699_v15 = vpop.permute.xlu1 %2698 }
0x1c2e   :  { %v2707_v34 = vsel %vm2702_vm14, %v2699_v15, 0 }
0x1c33   :  { %3222 = vmatpush3.bf16.xpose.msra.mxu0 %v2707_v34 }
0x1c35   :  { %v3343_v44 = vpop.eup %3342 }
0x1c36   :  { %v2605_v23 = vmul.f32 %v3343_v44, %v2602_v59 }
0x1c38   :  { %v2607_v25 = vsel %vm2606_vm15, %v2602_v59, %v2605_v23 }
0x1c39   :  { %v3345_v4 = vpop.eup %3344  ;;  %v2610_v63 = vsel %vm2608_vm1, %v2609_v24, %v2607_v25 }
0x1c3a   :  { %v2618_v26 = vadd.f32 1e-06, %v2610_v63  ;;  %v2612_v28 = vmul.f32 %v3345_v4, %v2603_v60 }
0x1c3c   :  { %v2614_v8 = vsel %vm2613_vm2, %v2603_v60, %v2612_v28  ;;  %3346 = vrcp.f32 %v2618_v26 }
0x1c3d   :  { %v2617_v54 = vsel %vm2615_vm3, %v2616_v29, %v2614_v8 }
0x1c3e   :  { %v2619_v30 = vadd.f32 1e-06, %v2617_v54 }
0x1c40   :  { %3348 = vrcp.f32 %v2619_v30 }
0x1c49   :  { %v3347_v11 = vpop.eup %3346 }
0x1c4a   :  { %v2621_v32 = vmul.f32 %v3347_v11, %v2592_v27 }
0x1c4d   :  { %v3349_v31 = vpop.eup %3348 }
0x1c4e   :  { %v2623_v33 = vmul.f32 %v3349_v31, %v2593_v19 }
0x1c50   :  { %v2624_v46 = vpack.c.bf16 %v2623_v33, %v2621_v32 }
0x1c52   :  { %3216 = vmatmul.mubr.msk.bf16.vlgmr.msra.gmra.mxu1 %vm86_vm0, %v2624_v46 }
0x1d12   :  { %v2683_v36 = vpop.f32.mrf.mxu1 }
0x1d13   :  { %v2684_v38 = vadd.f32 %v2840_v35, %v2683_v36 }
0x1d14   :  { %v3217_v37 = vpop.f32.mrf.mxu1 }
0x1d15   :  { %v2690_v43 = vmax.f32 %v2684_v38, 0.0 }
0x1d16   :  { %v2686_v39 = vpop.f32.mrf.mxu1 }
0x1d17   :  { %v2687_v51 = vadd.f32 %v2840_v35, %v2686_v39 }
0x1d18   :  { %v3218_v41 = vpop.f32.mrf.mxu1 }
0x1d19   :  { %v2691_v47 = vmax.f32 %v2687_v51, 0.0 }
0x1d1b   :  { %v2692_v49 = vpack.c.bf16 %v2691_v47, %v2690_v43 }
0x1d1d   :  { %3224 = vmatmul.mubr.msk.bf16.vlgmr.msra.gmra.mxu0 %vm2702_vm14, %v2692_v49 }
0x1ddd   :  { %v2746_v50 = vpop.f32.mrf.mxu0 }
0x1dde   :  { %v2747_v48 = vadd.f32 %v2844_v7, %v2746_v50 }
0x1ddf   :  { %v3225_v52 = vpop.f32.mrf.mxu0 }
0x1de0   :  { %v2753_v55 = vadd.f32 %v2747_v48, %v4002_v9 }
0x1de1   :  { %v2749_v58 = vpop.f32.mrf.mxu0 }
0x1de2   :  { %2755 = vst.msk [vmem:[#allocation10] sm:$0xff] %vm86_vm0, %v2753_v55  ;;  %v2750_v61 = vadd.f32 %v2844_v7, %v2749_v58 }
0x1de3   :  { %v3226_v42 = vpop.f32.mrf.mxu0 }
0x1de4   :  { %v2754_v5 = vadd.f32 %v2750_v61, %v4007_v14 }
0x1de6   :  { %2756 = vst.msk [vmem:[#allocation10 + $0x8] sm:$0xff] %vm86_vm0, %v2754_v5 }
0x1de7   :  { %3441 = shalt.err (!%p3438_p10)
}
0x1de8   :  { %2768 = dma.vmem_to_hbm [thread:$0]  %s2763_s24, 256, %s4037_s4, [#allocation4], %s3460_s20, %s3460_s20, %s3461_s21  }
0x1de9   :  { %3456 = dma.done.wait [#allocation4], 256  }
0x1dea   :  { %3457 = vsyncadd [#allocation4], 4294967040 }
0x1deb   :  { %2772 = vsyncpa [#allocation3], 1 }
0x1dec   :  { %2773 = vsyncpa [#allocation6], 1 }
0x1ded   :  { %2774 = vsyncpa [#allocation9], 1 }
0x1dee   :  { %2775 = vsyncpa [#allocation4], 1 }

</bundles_post_ra>
